<compile_context>
chip_gen: v7x
topology: tpu7x:2x2x1
jax: 0.10.0
libtpu: 0.0.40
codegen_flags: <defaults>
</compile_context>

<pallas_src>
import jax
import jax.numpy as jnp
from jax.experimental import pallas as pl
from jax.experimental.pallas import tpu as pltpu


def mlp_kernel(x_ref, w1_ref, b1_ref, w2_ref, b2_ref, o_ref):
    # First linear: cast the f32 x tile to bf16 on the VPU, MXU matmul with
    # f32 accumulation.
    x_bf = x_ref[...].astype(jnp.bfloat16)
    h = jnp.dot(x_bf, w1_ref[...], preferred_element_type=jnp.float32)  # (tb, H)
    # Bias + tanh in f32 (VPU + EUP); b1 is (1, H) and broadcasts.
    h = jnp.tanh(h + b1_ref[...])
    # Second linear (out_features == 1): contract hidden between the (1, H)
    # weight row and the (tb, H) activations -> (1, tb), i.e. the result is
    # already lane-dense (batch on the lane axis), so the store is unmasked.
    y = jax.lax.dot_general(
        w2_ref[...], h,
        dimension_numbers=(((1,), (1,)), ((), ())),
        preferred_element_type=jnp.float32)                            # (1, tb)
    o_ref[...] = (y + b2_ref[...]).astype(o_ref.dtype)


def netC_wgan_forward(x, w1, b1, w2, b2, *, tb=None, core_parallel=False):
    """x: (B, inputSize); w1: (inputSize, hidden); b1: (hidden,)/(1, hidden);
    w2: (hidden, 1); b2: (1,)/(1, 1)  ->  (B, 1).

    core_parallel=True is intended for v7x (2 TensorCores/chip)."""
    B, in_size = x.shape
    hidden = w1.shape[1]

    # Tile-size policy: one step for small batches; otherwise big, 128-aligned
    # (lane-aligned for the transposed output) batch tiles.
    if tb is None:
        tb = B if B <= 4096 else 2048
    tb = min(tb, B)
    if tb < B:
        tb = max(128, (tb // 128) * 128)
        if tb >= B:
            tb = B

    num_tiles = pl.cdiv(B, tb)
    padded = num_tiles * tb

    # Weights fed to the MXU in bf16 (tiny, one-time cast); biases / w2 row in
    # f32 for the VPU/EUP path.  x stays in its input dtype and is cast
    # in-kernel.
    w1_bf = w1.astype(jnp.bfloat16)
    w2_row = jnp.reshape(w2, (1, hidden)).astype(jnp.float32)
    b1_f32 = jnp.reshape(b1, (1, hidden)).astype(jnp.float32)
    b2_f32 = jnp.reshape(b2, (1, 1)).astype(jnp.float32)

    # Per-step VMEM footprint (Pallas double-buffers every spec by default).
    footprint = (
        2 * tb * in_size * x.dtype.itemsize   # x tile
        + 2 * in_size * hidden * 2            # w1 (bf16), VMEM-resident
        + 2 * (2 * hidden * 4 + 4)            # b1 + w2 row + b2 (f32)
        + 2 * tb * 4                          # output row
    )
    vmem_limit = int(min(100 * 1024 * 1024, max(4 * footprint, 8 * 1024 * 1024)))

    semantics = pltpu.CORE_PARALLEL if core_parallel else pltpu.PARALLEL

    flops = 2 * B * in_size * hidden + 2 * B * hidden
    bytes_accessed = (
        B * in_size * x.dtype.itemsize        # x (streamed once, no extra pass)
        + in_size * hidden * 2                # w1 (bf16)
        + 2 * hidden * 4 + 4                  # b1 + w2 row + b2
        + padded * 4                          # output
    )

    out_row = pl.pallas_call(
        mlp_kernel,
        out_shape=jax.ShapeDtypeStruct((1, padded), x.dtype),
        grid=(num_tiles,),
        in_specs=[
            # x tile streams over the batch grid (double-buffered by Pallas).
            pl.BlockSpec((tb, in_size), lambda i: (i, 0)),
            # Weights / biases: same block every step -> VMEM-resident.
            pl.BlockSpec((in_size, hidden), lambda i: (0, 0)),
            pl.BlockSpec((1, hidden), lambda i: (0, 0)),
            pl.BlockSpec((1, hidden), lambda i: (0, 0)),
            pl.BlockSpec((1, 1), lambda i: (0, 0)),
        ],
        # Lane-dense (1, tb) row per step.
        out_specs=pl.BlockSpec((1, tb), lambda i: (0, i)),
        compiler_params=pltpu.CompilerParams(
            dimension_semantics=(semantics,),
            vmem_limit_bytes=vmem_limit,
        ),
        cost_estimate=pl.CostEstimate(
            flops=flops,
            transcendentals=B * hidden,
            bytes_accessed=bytes_accessed,
        ),
    )(x, w1_bf, b1_f32, w2_row, b2_f32)

    # Re-assemble the lane-dense rows into the module's (B, 1) output.
    return out_row.reshape(padded)[:B].reshape(B, 1)


def init_params(key, input_size, hidden_size, dtype=jnp.float32):
    """Deterministic init matching nn.Linear's uniform(-1/sqrt(fan_in), ...).
    Weights are stored transposed (in, out) relative to PyTorch's (out, in)."""
    k1, k2, k3, k4 = jax.random.split(key, 4)
    bound1 = 1.0 / (input_size ** 0.5)
    bound2 = 1.0 / (hidden_size ** 0.5)
    w1 = jax.random.uniform(k1, (input_size, hidden_size), dtype, -bound1, bound1)
    b1 = jax.random.uniform(k2, (1, hidden_size), dtype, -bound1, bound1)
    w2 = jax.random.uniform(k3, (hidden_size, 1), dtype, -bound2, bound2)
    b2 = jax.random.uniform(k4, (1, 1), dtype, -bound2, bound2)
    return w1, b1, w2, b2


if __name__ == "__main__":
    input_size = 32
    hidden_size = 64
    batch = 1024

    key = jax.random.PRNGKey(0)
    kx, kp = jax.random.split(key)
    x = jax.random.normal(kx, (batch, input_size), jnp.float32)
    w1, b1, w2, b2 = init_params(kp, input_size, hidden_size)

    # Reference in plain JAX (same math as the PyTorch module, full f32).
    ref = jnp.tanh(x @ w1 + b1) @ w2 + b2

    # Default path: single grid step (tb == B), lane-dense output.
    out = jax.block_until_ready(netC_wgan_forward(x, w1, b1, w2, b2))
    assert out.shape == (batch, 1)
    # Loose tolerance: the MXU feed of x/w1 is bf16.
    assert jnp.allclose(out, ref, atol=2e-2, rtol=2e-2), (
        float(jnp.max(jnp.abs(out - ref))))

    # Multi-tile path: exercises the batch grid + lane-dense row re-assembly.
    out_t = jax.block_until_ready(netC_wgan_forward(x, w1, b1, w2, b2, tb=256))
    assert jnp.allclose(out_t, ref, atol=2e-2, rtol=2e-2)

    # Ragged batch (B not a multiple of the tile): last x block is partial and
    # the padded output rows are dropped in the wrapper.
    xr = jax.random.normal(kx, (200, input_size), jnp.float32)
    ref_r = jnp.tanh(xr @ w1 + b1) @ w2 + b2
    out_r = jax.block_until_ready(netC_wgan_forward(xr, w1, b1, w2, b2, tb=128))
    assert out_r.shape == (200, 1)
    assert jnp.allclose(out_r, ref_r, atol=2e-2, rtol=2e-2)

    print("KERNEL_OK")
</pallas_src>

<mosaic_0001>
module attributes {stable_mosaic.version = 11 : i64} {
  func.func @mlp_kernel(%arg0: i32, %arg1: memref<1024x32xf32, #tpu.memory_space<vmem>>, %arg2: memref<32x64xbf16, #tpu.memory_space<vmem>>, %arg3: memref<1x64xf32, #tpu.memory_space<vmem>>, %arg4: memref<1x64xf32, #tpu.memory_space<vmem>>, %arg5: memref<1x1xf32, #tpu.memory_space<vmem>>, %arg6: memref<1x1024xf32, #tpu.memory_space<vmem>>) attributes {dimension_semantics = [#tpu.dimension_semantics<parallel>], iteration_bounds = array<i64: 1>, scalar_prefetch = 0 : i64, scratch_operands = 0 : i64, tpu.core_type = #tpu.core_type<tc>, window_params = [{transform_indices = @transform_0, window_bounds = array<i64: 1024, 32>}, {pipeline_mode = #tpu.pipeline_mode<synchronous>, transform_indices = @transform_1, window_bounds = array<i64: 32, 64>}, {pipeline_mode = #tpu.pipeline_mode<synchronous>, transform_indices = @transform_2, window_bounds = array<i64: 1, 64>}, {pipeline_mode = #tpu.pipeline_mode<synchronous>, transform_indices = @transform_3, window_bounds = array<i64: 1, 64>}, {pipeline_mode = #tpu.pipeline_mode<synchronous>, transform_indices = @transform_4, window_bounds = array<i64: 1, 1>}, {transform_indices = @transform_5, window_bounds = array<i64: 1, 1024>}]} {
    %c0 = arith.constant 0 : index
    %c0_0 = arith.constant 0 : index
    %0 = vector.load %arg1[%c0, %c0_0] : memref<1024x32xf32, #tpu.memory_space<vmem>>, vector<1024x32xf32>
    %1 = arith.truncf %0 : vector<1024x32xf32> to vector<1024x32xbf16>
    %c0_1 = arith.constant 0 : index
    %c0_2 = arith.constant 0 : index
    %2 = vector.load %arg2[%c0_1, %c0_2] : memref<32x64xbf16, #tpu.memory_space<vmem>>, vector<32x64xbf16>
    %cst = arith.constant dense<0.000000e+00> : vector<1024x64xf32>
    %3 = tpu.matmul %1, %2, %cst {dimension_numbers = #tpu.dot_dimension_numbers<[1], [0], [0], [1], [0, 0, 1, 1], [], []>} : vector<1024x32xbf16>, vector<32x64xbf16>, vector<1024x64xf32> -> vector<1024x64xf32>
    %c0_3 = arith.constant 0 : index
    %c0_4 = arith.constant 0 : index
    %4 = vector.load %arg3[%c0_3, %c0_4] : memref<1x64xf32, #tpu.memory_space<vmem>>, vector<1x64xf32>
    %5 = vector.broadcast %4 : vector<1x64xf32> to vector<1024x64xf32>
    %6 = arith.addf %3, %5 : vector<1024x64xf32>
    %7 = math.tanh %6 : vector<1024x64xf32>
    %c0_5 = arith.constant 0 : index
    %c0_6 = arith.constant 0 : index
    %8 = vector.load %arg4[%c0_5, %c0_6] : memref<1x64xf32, #tpu.memory_space<vmem>>, vector<1x64xf32>
    %cst_7 = arith.constant dense<0.000000e+00> : vector<1x1024xf32>
    %9 = tpu.matmul %8, %7, %cst_7 {dimension_numbers = #tpu.dot_dimension_numbers<[1], [1], [0], [0], [0, 0, 1, 0], [], []>} : vector<1x64xf32>, vector<1024x64xf32>, vector<1x1024xf32> -> vector<1x1024xf32>
    %c0_8 = arith.constant 0 : index
    %c0_9 = arith.constant 0 : index
    %10 = vector.load %arg5[%c0_8, %c0_9] : memref<1x1xf32, #tpu.memory_space<vmem>>, vector<1x1xf32>
    %11 = vector.broadcast %10 : vector<1x1xf32> to vector<1x1024xf32>
    %12 = arith.addf %9, %11 : vector<1x1024xf32>
    %c0_10 = arith.constant 0 : index
    %c0_11 = arith.constant 0 : index
    %13 = vector.load %arg6[%c0_10, %c0_11] : memref<1x1024xf32, #tpu.memory_space<vmem>>, vector<1x1024xf32>
    tpu.vector_store %arg6[%c0_10, %c0_11], %12 {strides = array<i32>} : memref<1x1024xf32, #tpu.memory_space<vmem>>, vector<1x1024xf32>,
    return
  }
  func.func @transform_0(%arg0: i32) -> (i32, i32) {
    %c0_i32 = arith.constant 0 : i32
    %c0_i32_0 = arith.constant 0 : i32
    return %arg0, %c0_i32 : i32, i32
  }
  func.func @transform_1(%arg0: i32) -> (i32, i32) {
    %c0_i32 = arith.constant 0 : i32
    %c0_i32_0 = arith.constant 0 : i32
    %c0_i32_1 = arith.constant 0 : i32
    return %c0_i32, %c0_i32_0 : i32, i32
  }
  func.func @transform_2(%arg0: i32) -> (i32, i32) {
    %c0_i32 = arith.constant 0 : i32
    %c0_i32_0 = arith.constant 0 : i32
    %c0_i32_1 = arith.constant 0 : i32
    return %c0_i32, %c0_i32_0 : i32, i32
  }
  func.func @transform_3(%arg0: i32) -> (i32, i32) {
    %c0_i32 = arith.constant 0 : i32
    %c0_i32_0 = arith.constant 0 : i32
    %c0_i32_1 = arith.constant 0 : i32
    return %c0_i32, %c0_i32_0 : i32, i32
  }
  func.func @transform_4(%arg0: i32) -> (i32, i32) {
    %c0_i32 = arith.constant 0 : i32
    %c0_i32_0 = arith.constant 0 : i32
    %c0_i32_1 = arith.constant 0 : i32
    return %c0_i32, %c0_i32_0 : i32, i32
  }
  func.func @transform_5(%arg0: i32) -> (i32, i32) {
    %c0_i32 = arith.constant 0 : i32
    %c0_i32_0 = arith.constant 0 : i32
    return %c0_i32, %arg0 : i32, i32
  }
}

</mosaic_0001>

<bundles_post_ra>
// kernel: tpu_custom_call.1
= control target key start
LH: loop header
LB: loop body
LE: loop exit
PB: predicated region body
PF: predicated region fallthrough
CT: control target
= control target key end

     0   :  { %s3993_s0 = inlined_call_operand.vmem [shape: f32[1024,32], index: 0, kind: input, shape index: {}]   ;;  %s3994_s1 = inlined_call_operand.vmem [shape: bf16[32,64], index: 1, kind: input, shape index: {}]   ;;  %s3995_s2 = inlined_call_operand.vmem [shape: f32[1,64], index: 2, kind: input, shape index: {}]   ;;  %s3996_s3 = inlined_call_operand.vmem [shape: f32[1,64], index: 3, kind: input, shape index: {}]   ;;  %s3997_s4 = inlined_call_operand.<no memory space> [shape: f32[1,1], index: 4, kind: input, shape index: {}]   ;;  %s3998_s5 = inlined_call_operand.hbm [shape: f32[1,1024], index: 5, kind: output, shape index: {}]  }
   0x1   :  { %v10_v0 = vstv %s3997_s4 }
   0x2   :  { %11 = vst [vmem:[#allocation2] sm:$0x1] %v10_v0 }
   0x3   :  { %v2590_v1 = vld [vmem:[%s3994_s1] sm:$0xff]   ;;  %v2591_v2 = vld [vmem:[%s3994_s1 + $0x8] sm:$0xff]   ;;  %vm239_vm0 = vcmask 261120   ;;  %v26_v6 = vld [vmem:[%s3993_s0 + $0x10] sm:$0xff] }
   0x4   :  { %2262 = vmatprep.subr.bf16.mxu0 %v2590_v1  ;;  %v24_v3 = vld [vmem:[%s3993_s0] sm:$0xff]  ;;  %v25_v4 = vld [vmem:[%s3993_s0 + $0x8] sm:$0xff]  ;;  %v27_v7 = vld [vmem:[%s3993_s0 + $0x18] sm:$0xff] }
   0x5   :  { %2263 = vmatpush3.bf16.msra.mxu0 %v2590_v1  ;;  %v152_v5 = vpack.c.bf16 %v25_v4, %v24_v3  ;;  %v28_v8 = vld [vmem:[%s3993_s0 + $0x20] sm:$0xff]  ;;  %v29_v9 = vld [vmem:[%s3993_s0 + $0x28] sm:$0xff]  ;;  %v153_v10 = vpack.c.bf16 %v27_v7, %v26_v6  ;;  %v30_v12 = vld [vmem:[%s3993_s0 + $0x30] sm:$0xff] }
   0x6   :  { %2264 = vmatprep.subr.bf16.mxu0 %v2591_v2  ;;  %v154_v11 = vpack.c.bf16 %v29_v9, %v28_v8  ;;  %v31_v13 = vld [vmem:[%s3993_s0 + $0x38] sm:$0xff]  ;;  %v32_v14 = vld [vmem:[%s3993_s0 + $0x40] sm:$0xff]  ;;  %v33_v15 = vld [vmem:[%s3993_s0 + $0x48] sm:$0xff] }
   0x7   :  { %2266 = vmatprep.mubr.msk.bf16.mxu0 %vm239_vm0, %v152_v5  ;;  %v155_v16 = vpack.c.bf16 %v31_v13, %v30_v12  ;;  %v156_v17 = vpack.c.bf16 %v33_v15, %v32_v14  ;;  %v34_v18 = vld [vmem:[%s3993_s0 + $0x50] sm:$0xff]  ;;  %v35_v19 = vld [vmem:[%s3993_s0 + $0x58] sm:$0xff]  ;;  %v36_v20 = vld [vmem:[%s3993_s0 + $0x60] sm:$0xff] }
   0x8   :  { %v37_v21 = vld [vmem:[%s3993_s0 + $0x68] sm:$0xff]  ;;  %v157_v22 = vpack.c.bf16 %v35_v19, %v34_v18  ;;  %v38_v24 = vld [vmem:[%s3993_s0 + $0x70] sm:$0xff]  ;;  %v39_v25 = vld [vmem:[%s3993_s0 + $0x78] sm:$0xff] }
   0x9   :  { %2265 = vmatpush3.bf16.msra.mxu0 %v2591_v2  ;;  %v158_v23 = vpack.c.bf16 %v37_v21, %v36_v20  ;;  %v40_v26 = vld [vmem:[%s3993_s0 + $0x80] sm:$0xff]  ;;  %v41_v27 = vld [vmem:[%s3993_s0 + $0x88] sm:$0xff] }
   0xc   :  { %2267 = vmatmul.mubr.msk.bf16.vlgmr.msra.gmra.mrb[0].mxu0 %vm239_vm0, %v153_v10 }
   0xd   :  { %2270 = vmatprep.mubr.msk.bf16.mxu0 %vm239_vm0, %v154_v11 }
  0x14   :  { %2271 = vmatmul.mubr.msk.bf16.gmra.mrb[4].mxu0 %vm239_vm0, %v155_v16 }
  0x15   :  { %2274 = vmatprep.mubr.msk.bf16.mxu0 %vm239_vm0, %v156_v17 }
  0x1c   :  { %2275 = vmatmul.mubr.msk.bf16.gmra.mrb[8].mxu0 %vm239_vm0, %v157_v22 }
  0x1d   :  { %2278 = vmatprep.mubr.msk.bf16.mxu0 %vm239_vm0, %v158_v23 }
  0x1e   :  { %12 = vsyncpa [#allocation4], 0  ;;  %v159_v28 = vpack.c.bf16 %v39_v25, %v38_v24  ;;  %v160_v29 = vpack.c.bf16 %v41_v27, %v40_v26  ;;  %v42_v30 = vld [vmem:[%s3993_s0 + $0x90] sm:$0xff]  ;;  %v43_v31 = vld [vmem:[%s3993_s0 + $0x98] sm:$0xff]  ;;  %vm1116_vm1 = vcmask 523264  }
  0x1f   :  { %v44_v32 = vld [vmem:[%s3993_s0 + $0xa0] sm:$0xff]  ;;  %v45_v33 = vld [vmem:[%s3993_s0 + $0xa8] sm:$0xff]  ;;  %v161_v34 = vpack.c.bf16 %v43_v31, %v42_v30  ;;  %v46_v36 = vld [vmem:[%s3993_s0 + $0xb0] sm:$0xff] }
  0x20   :  { %v162_v35 = vpack.c.bf16 %v45_v33, %v44_v32  ;;  %v47_v37 = vld [vmem:[%s3993_s0 + $0xb8] sm:$0xff]  ;;  %v48_v38 = vld [vmem:[%s3993_s0 + $0xc0] sm:$0xff]  ;;  %v49_v39 = vld [vmem:[%s3993_s0 + $0xc8] sm:$0xff] }
  0x21   :  { %v163_v40 = vpack.c.bf16 %v47_v37, %v46_v36  ;;  %v164_v41 = vpack.c.bf16 %v49_v39, %v48_v38  ;;  %v50_v42 = vld [vmem:[%s3993_s0 + $0xd0] sm:$0xff]  ;;  %v51_v43 = vld [vmem:[%s3993_s0 + $0xd8] sm:$0xff]  ;;  %v52_v44 = vld [vmem:[%s3993_s0 + $0xe0] sm:$0xff] }
  0x22   :  { %v53_v45 = vld [vmem:[%s3993_s0 + $0xe8] sm:$0xff]  ;;  %v165_v46 = vpack.c.bf16 %v51_v43, %v50_v42  ;;  %v54_v48 = vld [vmem:[%s3993_s0 + $0xf0] sm:$0xff]  ;;  %v55_v49 = vld [vmem:[%s3993_s0 + $0xf8] sm:$0xff] }
  0x23   :  { %v166_v47 = vpack.c.bf16 %v53_v45, %v52_v44  ;;  %v56_v50 = vld [vmem:[%s3993_s0 + $0x100] sm:$0xff]  ;;  %v57_v51 = vld [vmem:[%s3993_s0 + $0x108] sm:$0xff]  ;;  %v167_v52 = vpack.c.bf16 %v55_v49, %v54_v48  ;;  %v58_v54 = vld [vmem:[%s3993_s0 + $0x110] sm:$0xff] }
  0x24   :  { %2279 = vmatmul.mubr.msk.bf16.gmra.mrb[12].mxu0 %vm239_vm0, %v159_v28  ;;  %v168_v53 = vpack.c.bf16 %v57_v51, %v56_v50  ;;  %v59_v55 = vld [vmem:[%s3993_s0 + $0x118] sm:$0xff]  ;;  %v60_v56 = vld [vmem:[%s3993_s0 + $0x120] sm:$0xff]  ;;  %v61_v57 = vld [vmem:[%s3993_s0 + $0x128] sm:$0xff] }
  0x25   :  { %2282 = vmatprep.mubr.msk.bf16.mxu0 %vm239_vm0, %v160_v29  ;;  %v169_v58 = vpack.c.bf16 %v59_v55, %v58_v54  ;;  %v170_v59 = vpack.c.bf16 %v61_v57, %v60_v56  ;;  %v62_v60 = vld [vmem:[%s3993_s0 + $0x130] sm:$0xff]  ;;  %v63_v61 = vld [vmem:[%s3993_s0 + $0x138] sm:$0xff]  ;;  %v64_v62 = vld [vmem:[%s3993_s0 + $0x140] sm:$0xff] }
  0x26   :  { %v65_v63 = vld [vmem:[%s3993_s0 + $0x148] sm:$0xff]  ;;  %v171_v0 = vpack.c.bf16 %v63_v61, %v62_v60  ;;  %v66_v2 = vld [vmem:[%s3993_s0 + $0x150] sm:$0xff]  ;;  %v67_v3 = vld [vmem:[%s3993_s0 + $0x158] sm:$0xff] }
  0x27   :  { %v172_v1 = vpack.c.bf16 %v65_v63, %v64_v62  ;;  %v68_v4 = vld [vmem:[%s3993_s0 + $0x160] sm:$0xff]  ;;  %v69_v5 = vld [vmem:[%s3993_s0 + $0x168] sm:$0xff]  ;;  %v173_v6 = vpack.c.bf16 %v67_v3, %v66_v2  ;;  %v70_v8 = vld [vmem:[%s3993_s0 + $0x170] sm:$0xff] }
  0x28   :  { %v174_v7 = vpack.c.bf16 %v69_v5, %v68_v4  ;;  %v71_v9 = vld [vmem:[%s3993_s0 + $0x178] sm:$0xff]  ;;  %v72_v10 = vld [vmem:[%s3993_s0 + $0x180] sm:$0xff]  ;;  %v73_v11 = vld [vmem:[%s3993_s0 + $0x188] sm:$0xff] }
  0x29   :  { %v175_v12 = vpack.c.bf16 %v71_v9, %v70_v8  ;;  %v176_v13 = vpack.c.bf16 %v73_v11, %v72_v10  ;;  %v74_v14 = vld [vmem:[%s3993_s0 + $0x190] sm:$0xff]  ;;  %v75_v15 = vld [vmem:[%s3993_s0 + $0x198] sm:$0xff]  ;;  %v76_v16 = vld [vmem:[%s3993_s0 + $0x1a0] sm:$0xff] }
  0x2a   :  { %v77_v17 = vld [vmem:[%s3993_s0 + $0x1a8] sm:$0xff]  ;;  %v177_v18 = vpack.c.bf16 %v75_v15, %v74_v14  ;;  %v78_v20 = vld [vmem:[%s3993_s0 + $0x1b0] sm:$0xff]  ;;  %v79_v21 = vld [vmem:[%s3993_s0 + $0x1b8] sm:$0xff] }
  0x2b   :  { %v178_v19 = vpack.c.bf16 %v77_v17, %v76_v16  ;;  %v80_v22 = vld [vmem:[%s3993_s0 + $0x1c0] sm:$0xff]  ;;  %v81_v23 = vld [vmem:[%s3993_s0 + $0x1c8] sm:$0xff]  ;;  %v179_v24 = vpack.c.bf16 %v79_v21, %v78_v20  ;;  %v82_v26 = vld [vmem:[%s3993_s0 + $0x1d0] sm:$0xff] }
  0x2c   :  { %2283 = vmatmul.mubr.msk.bf16.gmra.mrb[16].mxu0 %vm239_vm0, %v161_v34  ;;  %v180_v25 = vpack.c.bf16 %v81_v23, %v80_v22  ;;  %v83_v27 = vld [vmem:[%s3993_s0 + $0x1d8] sm:$0xff]  ;;  %v84_v28 = vld [vmem:[%s3993_s0 + $0x1e0] sm:$0xff]  ;;  %v85_v29 = vld [vmem:[%s3993_s0 + $0x1e8] sm:$0xff] }
  0x2d   :  { %2286 = vmatprep.mubr.msk.bf16.mxu0 %vm239_vm0, %v162_v35  ;;  %v181_v30 = vpack.c.bf16 %v83_v27, %v82_v26  ;;  %v182_v31 = vpack.c.bf16 %v85_v29, %v84_v28  ;;  %v86_v32 = vld [vmem:[%s3993_s0 + $0x1f0] sm:$0xff]  ;;  %v87_v33 = vld [vmem:[%s3993_s0 + $0x1f8] sm:$0xff]  ;;  %v88_v34 = vld [vmem:[%s3993_s0 + $0x200] sm:$0xff] }
  0x2e   :  { %v89_v35 = vld [vmem:[%s3993_s0 + $0x208] sm:$0xff]  ;;  %v183_v36 = vpack.c.bf16 %v87_v33, %v86_v32  ;;  %v90_v38 = vld [vmem:[%s3993_s0 + $0x210] sm:$0xff]  ;;  %v91_v39 = vld [vmem:[%s3993_s0 + $0x218] sm:$0xff] }
  0x2f   :  { %v184_v37 = vpack.c.bf16 %v89_v35, %v88_v34  ;;  %v185_v42 = vpack.c.bf16 %v91_v39, %v90_v38  ;;  %v94_v44 = vld [vmem:[%s3993_s0 + $0x230] sm:$0xff]  ;;  %v95_v45 = vld [vmem:[%s3993_s0 + $0x238] sm:$0xff]  ;;  %v3288_v33 = vld [vmem:[%s3996_s3] sm:$0x1] }
  0x30   :  { %v187_v48 = vpack.c.bf16 %v95_v45, %v94_v44  ;;  %v98_v50 = vld [vmem:[%s3993_s0 + $0x250] sm:$0xff]  ;;  %v99_v51 = vld [vmem:[%s3993_s0 + $0x258] sm:$0xff]  ;;  %2158 = vmatprep.mubr.msk.f32.mxu1 %vm1116_vm1, %v3288_v33  ;;  %v133_v38 = vld [vmem:[%s3993_s0 + $0x368] sm:$0xff] }
  0x31   :  { %v189_v54 = vpack.c.bf16 %v99_v51, %v98_v50  ;;  %v102_v56 = vld [vmem:[%s3993_s0 + $0x270] sm:$0xff]  ;;  %v103_v57 = vld [vmem:[%s3993_s0 + $0x278] sm:$0xff]  ;;  %v136_v44 = vld [vmem:[%s3993_s0 + $0x380] sm:$0xff] }
  0x32   :  { %v191_v60 = vpack.c.bf16 %v103_v57, %v102_v56  ;;  %v106_v62 = vld [vmem:[%s3993_s0 + $0x290] sm:$0xff]  ;;  %v107_v63 = vld [vmem:[%s3993_s0 + $0x298] sm:$0xff]  ;;  %v137_v45 = vld [vmem:[%s3993_s0 + $0x388] sm:$0xff] }
  0x33   :  { %v193_v2 = vpack.c.bf16 %v107_v63, %v106_v62  ;;  %v110_v4 = vld [vmem:[%s3993_s0 + $0x2b0] sm:$0xff]  ;;  %v111_v5 = vld [vmem:[%s3993_s0 + $0x2b8] sm:$0xff]  ;;  %vm3450_vm2 = vmpackc.low %vm1116_vm1, %vm1116_vm1 }
  0x34   :  { %2287 = vmatmul.mubr.msk.bf16.gmra.mrb[20].mxu0 %vm239_vm0, %v163_v40  ;;  %v92_v40 = vld [vmem:[%s3993_s0 + $0x220] sm:$0xff]  ;;  %v195_v8 = vpack.c.bf16 %v111_v5, %v110_v4  ;;  %v114_v10 = vld [vmem:[%s3993_s0 + $0x2d0] sm:$0xff]  ;;  %v115_v11 = vld [vmem:[%s3993_s0 + $0x2d8] sm:$0xff] }
  0x35   :  { %2290 = vmatprep.mubr.msk.bf16.mxu0 %vm239_vm0, %v164_v41  ;;  %v93_v41 = vld [vmem:[%s3993_s0 + $0x228] sm:$0xff]  ;;  %v197_v14 = vpack.c.bf16 %v115_v11, %v114_v10  ;;  %v118_v16 = vld [vmem:[%s3993_s0 + $0x2f0] sm:$0xff]  ;;  %v119_v17 = vld [vmem:[%s3993_s0 + $0x2f8] sm:$0xff] }
  0x36   :  { %v186_v43 = vpack.c.bf16 %v93_v41, %v92_v40  ;;  %v199_v20 = vpack.c.bf16 %v119_v17, %v118_v16  ;;  %v122_v22 = vld [vmem:[%s3993_s0 + $0x310] sm:$0xff]  ;;  %v123_v23 = vld [vmem:[%s3993_s0 + $0x318] sm:$0xff]  ;;  %v3310_v41 = vld [vmem:[%s3995_s2] ss:$0 sm:$0xff] }
  0x37   :  { %v201_v26 = vpack.c.bf16 %v123_v23, %v122_v22  ;;  %v126_v28 = vld [vmem:[%s3993_s0 + $0x330] sm:$0xff]  ;;  %v127_v29 = vld [vmem:[%s3993_s0 + $0x338] sm:$0xff]  ;;  %v144_v11 = vld [vmem:[%s3993_s0 + $0x3c0] sm:$0xff] }
  0x38   :  { %v203_v32 = vpack.c.bf16 %v127_v29, %v126_v28  ;;  %v130_v35 = vld [vmem:[%s3993_s0 + $0x350] sm:$0xff]  ;;  %v139_v57 = vld [vmem:[%s3993_s0 + $0x398] sm:$0xff] }
  0x39   :  { %v138_v56 = vld [vmem:[%s3993_s0 + $0x390] sm:$0xff]  ;;  %v147_v29 = vld [vmem:[%s3993_s0 + $0x3d8] sm:$0xff] }
  0x3a   :  { %v209_v63 = vpack.c.bf16 %v139_v57, %v138_v56  ;;  %v146_v28 = vld [vmem:[%s3993_s0 + $0x3d0] sm:$0xff] }
  0x3c   :  { %2291 = vmatmul.mubr.msk.bf16.gmra.mrb[24].mxu0 %vm239_vm0, %v165_v46  ;;  %v96_v46 = vld [vmem:[%s3993_s0 + $0x240] sm:$0xff] }
  0x3d   :  { %2294 = vmatprep.mubr.msk.bf16.mxu0 %vm239_vm0, %v166_v47  ;;  %v97_v47 = vld [vmem:[%s3993_s0 + $0x248] sm:$0xff] }
  0x3e   :  { %v188_v49 = vpack.c.bf16 %v97_v47, %v96_v46 }
  0x44   :  { %2295 = vmatmul.mubr.msk.bf16.gmra.mrb[28].mxu0 %vm239_vm0, %v167_v52  ;;  %v100_v52 = vld [vmem:[%s3993_s0 + $0x260] sm:$0xff] }
  0x45   :  { %2298 = vmatprep.mubr.msk.bf16.mxu0 %vm239_vm0, %v168_v53  ;;  %v101_v53 = vld [vmem:[%s3993_s0 + $0x268] sm:$0xff] }
  0x46   :  { %v190_v55 = vpack.c.bf16 %v101_v53, %v100_v52  ;;  %v208_v52 = vpack.c.bf16 %v137_v45, %v136_v44 }
  0x4c   :  { %2299 = vmatmul.mubr.msk.bf16.gmra.mrb[32].mxu0 %vm239_vm0, %v169_v58  ;;  %v104_v58 = vld [vmem:[%s3993_s0 + $0x280] sm:$0xff] }
  0x4d   :  { %2302 = vmatprep.mubr.msk.bf16.mxu0 %vm239_vm0, %v170_v59  ;;  %v105_v59 = vld [vmem:[%s3993_s0 + $0x288] sm:$0xff] }
  0x4e   :  { %v192_v61 = vpack.c.bf16 %v105_v59, %v104_v58  ;;  %v140_v58 = vld [vmem:[%s3993_s0 + $0x3a0] sm:$0xff]  ;;  %v141_v59 = vld [vmem:[%s3993_s0 + $0x3a8] sm:$0xff] }
  0x54   :  { %2303 = vmatmul.mubr.msk.bf16.gmra.mrb[36].mxu0 %vm239_vm0, %v171_v0  ;;  %v108_v0 = vld [vmem:[%s3993_s0 + $0x2a0] sm:$0xff] }
  0x55   :  { %2306 = vmatprep.mubr.msk.bf16.mxu0 %vm239_vm0, %v172_v1  ;;  %v109_v1 = vld [vmem:[%s3993_s0 + $0x2a8] sm:$0xff] }
  0x56   :  { %v194_v3 = vpack.c.bf16 %v109_v1, %v108_v0 }
  0x5c   :  { %2307 = vmatmul.mubr.msk.bf16.gmra.mrb[40].mxu0 %vm239_vm0, %v173_v6  ;;  %v112_v6 = vld [vmem:[%s3993_s0 + $0x2c0] sm:$0xff] }
  0x5d   :  { %2310 = vmatprep.mubr.msk.bf16.mxu0 %vm239_vm0, %v174_v7  ;;  %v113_v7 = vld [vmem:[%s3993_s0 + $0x2c8] sm:$0xff] }
  0x5e   :  { %v196_v9 = vpack.c.bf16 %v113_v7, %v112_v6 }
  0x64   :  { %2311 = vmatmul.mubr.msk.bf16.gmra.mrb[44].mxu0 %vm239_vm0, %v175_v12  ;;  %v116_v12 = vld [vmem:[%s3993_s0 + $0x2e0] sm:$0xff] }
  0x65   :  { %2314 = vmatprep.mubr.msk.bf16.mxu0 %vm239_vm0, %v176_v13  ;;  %v117_v13 = vld [vmem:[%s3993_s0 + $0x2e8] sm:$0xff] }
  0x66   :  { %v198_v15 = vpack.c.bf16 %v117_v13, %v116_v12  ;;  %v145_v12 = vld [vmem:[%s3993_s0 + $0x3c8] sm:$0xff] }
  0x67   :  { %v212_v22 = vpack.c.bf16 %v145_v12, %v144_v11 }
  0x6c   :  { %2315 = vmatmul.mubr.msk.bf16.gmra.mrb[48].mxu0 %vm239_vm0, %v177_v18  ;;  %v120_v18 = vld [vmem:[%s3993_s0 + $0x300] sm:$0xff] }
  0x6d   :  { %2318 = vmatprep.mubr.msk.bf16.mxu0 %vm239_vm0, %v178_v19  ;;  %v121_v19 = vld [vmem:[%s3993_s0 + $0x308] sm:$0xff] }
  0x6e   :  { %v200_v21 = vpack.c.bf16 %v121_v19, %v120_v18 }
  0x74   :  { %2319 = vmatmul.mubr.msk.bf16.gmra.mrb[52].mxu0 %vm239_vm0, %v179_v24  ;;  %v124_v24 = vld [vmem:[%s3993_s0 + $0x320] sm:$0xff] }
  0x75   :  { %2322 = vmatprep.mubr.msk.bf16.mxu0 %vm239_vm0, %v180_v25  ;;  %v125_v25 = vld [vmem:[%s3993_s0 + $0x328] sm:$0xff] }
  0x76   :  { %v202_v27 = vpack.c.bf16 %v125_v25, %v124_v24 }
  0x7c   :  { %2323 = vmatmul.mubr.msk.bf16.gmra.mrb[56].mxu0 %vm239_vm0, %v181_v30  ;;  %v128_v30 = vld [vmem:[%s3993_s0 + $0x340] sm:$0xff] }
  0x7d   :  { %2326 = vmatprep.mubr.msk.bf16.mxu0 %vm239_vm0, %v182_v31  ;;  %v129_v31 = vld [vmem:[%s3993_s0 + $0x348] sm:$0xff] }
  0x7e   :  { %v204_v34 = vpack.c.bf16 %v129_v31, %v128_v30  ;;  %v148_v31 = vld [vmem:[%s3993_s0 + $0x3e0] sm:$0xff] }
  0x84   :  { %2327 = vmatmul.mubr.msk.bf16.gmra.mrb[60].mxu0 %vm239_vm0, %v183_v36  ;;  %v131_v36 = vld [vmem:[%s3993_s0 + $0x358] sm:$0xff] }
  0x85   :  { %2330 = vmatprep.mubr.msk.bf16.mxu0 %vm239_vm0, %v184_v37  ;;  %v132_v37 = vld [vmem:[%s3993_s0 + $0x360] sm:$0xff]  ;;  %v205_v39 = vpack.c.bf16 %v131_v36, %v130_v35 }
  0x86   :  { %v206_v40 = vpack.c.bf16 %v133_v38, %v132_v37 }
  0x8c   :  { %2331 = vmatmul.mubr.msk.bf16.gmra.mrb[64].mxu0 %vm239_vm0, %v185_v42  ;;  %v134_v42 = vld [vmem:[%s3993_s0 + $0x370] sm:$0xff] }
  0x8d   :  { %2334 = vmatprep.mubr.msk.bf16.mxu0 %vm239_vm0, %v186_v43  ;;  %v135_v43 = vld [vmem:[%s3993_s0 + $0x378] sm:$0xff] }
  0x94   :  { %2335 = vmatmul.mubr.msk.bf16.gmra.mrb[68].mxu0 %vm239_vm0, %v187_v48 }
  0x95   :  { %2338 = vmatprep.mubr.msk.bf16.mxu0 %vm239_vm0, %v188_v49  ;;  %v207_v49 = vpack.c.bf16 %v135_v43, %v134_v42 }
  0x9c   :  { %2339 = vmatmul.mubr.msk.bf16.gmra.mrb[72].mxu0 %vm239_vm0, %v189_v54 }
  0x9d   :  { %2342 = vmatprep.mubr.msk.bf16.mxu0 %vm239_vm0, %v190_v55 }
  0xa4   :  { %2343 = vmatmul.mubr.msk.bf16.gmra.mrb[76].mxu0 %vm239_vm0, %v191_v60 }
  0xa5   :  { %2346 = vmatprep.mubr.msk.bf16.mxu0 %vm239_vm0, %v192_v61 }
  0xac   :  { %2347 = vmatmul.mubr.msk.bf16.gmra.mrb[80].mxu0 %vm239_vm0, %v193_v2  ;;  %v210_v2 = vpack.c.bf16 %v141_v59, %v140_v58 }
  0xad   :  { %2350 = vmatprep.mubr.msk.bf16.mxu0 %vm239_vm0, %v194_v3 }
  0xb4   :  { %2351 = vmatmul.mubr.msk.bf16.gmra.mrb[84].mxu0 %vm239_vm0, %v195_v8  ;;  %v142_v8 = vld [vmem:[%s3993_s0 + $0x3b0] sm:$0xff] }
  0xb5   :  { %2354 = vmatprep.mubr.msk.bf16.mxu0 %vm239_vm0, %v196_v9  ;;  %v143_v9 = vld [vmem:[%s3993_s0 + $0x3b8] sm:$0xff] }
  0xb6   :  { %v211_v18 = vpack.c.bf16 %v143_v9, %v142_v8 }
  0xbc   :  { %2355 = vmatmul.mubr.msk.bf16.gmra.mrb[88].mxu0 %vm239_vm0, %v197_v14 }
  0xbd   :  { %2358 = vmatprep.mubr.msk.bf16.mxu0 %vm239_vm0, %v198_v15 }
  0xc4   :  { %2359 = vmatmul.mubr.msk.bf16.gmra.mrb[92].mxu0 %vm239_vm0, %v199_v20 }
  0xc5   :  { %2362 = vmatprep.mubr.msk.bf16.mxu0 %vm239_vm0, %v200_v21 }
  0xcc   :  { %2363 = vmatmul.mubr.msk.bf16.gmra.mrb[96].mxu0 %vm239_vm0, %v201_v26 }
  0xcd   :  { %2366 = vmatprep.mubr.msk.bf16.mxu0 %vm239_vm0, %v202_v27 }
  0xd4   :  { %2367 = vmatmul.mubr.msk.bf16.gmra.mrb[100].mxu0 %vm239_vm0, %v203_v32  ;;  %v149_v32 = vld [vmem:[%s3993_s0 + $0x3e8] sm:$0xff] }
  0xd5   :  { %2370 = vmatprep.mubr.msk.bf16.mxu0 %vm239_vm0, %v204_v34  ;;  %v214_v44 = vpack.c.bf16 %v149_v32, %v148_v31 }
  0xdc   :  { %2371 = vmatmul.mubr.msk.bf16.gmra.mrb[104].mxu0 %vm239_vm0, %v205_v39  ;;  %v213_v39 = vpack.c.bf16 %v147_v29, %v146_v28 }
  0xdd   :  { %2374 = vmatprep.mubr.msk.bf16.mxu0 %vm239_vm0, %v206_v40 }
  0xdf   :  { %v2268_v46 = vpop.f32.mrb[0].mxu0 }
  0xe0   :  { %v475_v47 = vadd.f32 %v2268_v46, %v3310_v41  ;;  %v466_v48 = vpop.f32.mrb[1].mxu0 }
  0xe1   :  { %v467_v50 = vadd.f32 %v3310_v41, %v466_v48  ;;  %v2269_v51 = vpop.f32.mrb[2].mxu0 }
  0xe2   :  { %2592 = vtanh.f32 %v475_v47  ;;  %v478_v53 = vadd.f32 %v2269_v51, %v3310_v41  ;;  %v469_v54 = vpop.f32.mrb[3].mxu0  ;;  %v151_v51 = vld [vmem:[%s3993_s0 + $0x3f8] sm:$0xff] }
  0xe3   :  { %2594 = vtanh.f32 %v467_v50  ;;  %v470_v55 = vadd.f32 %v3310_v41, %v469_v54  ;;  %v150_v50 = vld [vmem:[%s3993_s0 + $0x3f0] sm:$0xff] }
  0xe4   :  { %2596 = vtanh.f32 %v478_v53  ;;  %2375 = vmatmul.mubr.msk.bf16.gmra.mrb[108].mxu0 %vm239_vm0, %v207_v49  ;;  %v215_v58 = vpack.c.bf16 %v151_v51, %v150_v50 }
  0xe5   :  { %2598 = vtanh.f32 %v470_v55  ;;  %2378 = vmatprep.mubr.msk.bf16.mxu0 %vm239_vm0, %v208_v52 }
  0xe7   :  { %v2272_v60 = vpop.f32.mrb[4].mxu0 }
  0xe8   :  { %v491_v61 = vadd.f32 %v2272_v60, %v3310_v41  ;;  %v482_v62 = vpop.f32.mrb[5].mxu0 }
  0xe9   :  { %v483_v0 = vadd.f32 %v3310_v41, %v482_v62  ;;  %v2273_v1 = vpop.f32.mrb[6].mxu0 }
  0xea   :  { %2600 = vtanh.f32 %v491_v61  ;;  %v494_v3 = vadd.f32 %v2273_v1, %v3310_v41  ;;  %v485_v4 = vpop.f32.mrb[7].mxu0 }
  0xeb   :  { %2602 = vtanh.f32 %v483_v0  ;;  %v486_v5 = vadd.f32 %v3310_v41, %v485_v4 }
  0xec   :  { %v3347_v6 = vpop.eup %2592  ;;  %2604 = vtanh.f32 %v494_v3  ;;  %2379 = vmatmul.mubr.msk.bf16.gmra.mrb[112].mxu0 %vm239_vm0, %v209_v63 }
  0xed   :  { %v3350_v7 = vpop.eup %2594  ;;  %2606 = vtanh.f32 %v486_v5  ;;  %2382 = vmatprep.mubr.msk.bf16.mxu0 %vm239_vm0, %v210_v2 }
  0xee   :  { %v3359_v10 = vpop.eup %2596 }
  0xef   :  { %v3367_v13 = vpop.eup %2598  ;;  %v2276_v14 = vpop.f32.mrb[8].mxu0  ;;  %v2403_v15 = vpack.c.bf16 %v3359_v10, %v3347_v6 }
  0xf0   :  { %v507_v16 = vadd.f32 %v2276_v14, %v3310_v41  ;;  %v498_v17 = vpop.f32.mrb[9].mxu0  ;;  %v2397_v19 = vpack.c.bf16 %v3367_v13, %v3350_v7 }
  0xf1   :  { %v499_v20 = vadd.f32 %v3310_v41, %v498_v17  ;;  %v2277_v21 = vpop.f32.mrb[10].mxu0 }
  0xf2   :  { %2608 = vtanh.f32 %v507_v16  ;;  %v510_v23 = vadd.f32 %v2277_v21, %v3310_v41  ;;  %v501_v24 = vpop.f32.mrb[11].mxu0 }
  0xf3   :  { %2610 = vtanh.f32 %v499_v20  ;;  %v502_v25 = vadd.f32 %v3310_v41, %v501_v24 }
  0xf4   :  { %v3377_v26 = vpop.eup %2600  ;;  %2612 = vtanh.f32 %v510_v23  ;;  %2383 = vmatmul.mubr.msk.bf16.gmra.mrb[116].mxu0 %vm239_vm0, %v211_v18 }
  0xf5   :  { %v3380_v27 = vpop.eup %2602  ;;  %2614 = vtanh.f32 %v502_v25  ;;  %2386 = vmatprep.mubr.msk.bf16.mxu0 %vm239_vm0, %v212_v22 }
  0xf6   :  { %v3389_v30 = vpop.eup %2604 }
  0xf7   :  { %v3397_v34 = vpop.eup %2606  ;;  %v2280_v35 = vpop.f32.mrb[12].mxu0  ;;  %v2415_v36 = vpack.c.bf16 %v3389_v30, %v3377_v26 }
  0xf8   :  { %v523_v37 = vadd.f32 %v2280_v35, %v3310_v41  ;;  %v514_v38 = vpop.f32.mrb[13].mxu0  ;;  %v2409_v40 = vpack.c.bf16 %v3397_v34, %v3380_v27 }
  0xf9   :  { %v515_v42 = vadd.f32 %v3310_v41, %v514_v38  ;;  %v2281_v43 = vpop.f32.mrb[14].mxu0 }
  0xfa   :  { %2616 = vtanh.f32 %v523_v37  ;;  %v526_v45 = vadd.f32 %v2281_v43, %v3310_v41  ;;  %v517_v46 = vpop.f32.mrb[15].mxu0 }
  0xfb   :  { %2618 = vtanh.f32 %v515_v42  ;;  %v518_v47 = vadd.f32 %v3310_v41, %v517_v46 }
  0xfc   :  { %v3407_v48 = vpop.eup %2608  ;;  %2620 = vtanh.f32 %v526_v45  ;;  %2387 = vmatmul.mubr.msk.bf16.gmra.mrb[120].mxu0 %vm239_vm0, %v213_v39 }
  0xfd   :  { %v3410_v49 = vpop.eup %2610  ;;  %2622 = vtanh.f32 %v518_v47  ;;  %2390 = vmatprep.mubr.msk.bf16.mxu0 %vm239_vm0, %v214_v44 }
  0xfe   :  { %v3419_v52 = vpop.eup %2612 }
  0xff   :  { %v3421_v53 = vpop.eup %2614  ;;  %v2284_v54 = vpop.f32.mrb[16].mxu0  ;;  %v2427_v55 = vpack.c.bf16 %v3419_v52, %v3407_v48 }
 0x100   :  { %v539_v56 = vadd.f32 %v2284_v54, %v3310_v41  ;;  %v530_v57 = vpop.f32.mrb[17].mxu0  ;;  %v2421_v59 = vpack.c.bf16 %v3421_v53, %v3410_v49 }
 0x101   :  { %v531_v60 = vadd.f32 %v3310_v41, %v530_v57  ;;  %v2285_v61 = vpop.f32.mrb[18].mxu0 }
 0x102   :  { %2624 = vtanh.f32 %v539_v56  ;;  %v542_v62 = vadd.f32 %v2285_v61, %v3310_v41  ;;  %v533_v63 = vpop.f32.mrb[19].mxu0 }
 0x103   :  { %2626 = vtanh.f32 %v531_v60  ;;  %v534_v0 = vadd.f32 %v3310_v41, %v533_v63 }
 0x104   :  { %v3431_v1 = vpop.eup %2616  ;;  %2628 = vtanh.f32 %v542_v62  ;;  %2391 = vmatmul.mubr.msk.bf16.gmra.mrb[124].mxu0 %vm239_vm0, %v215_v58 }
 0x105   :  { %v3434_v2 = vpop.eup %2618  ;;  %2630 = vtanh.f32 %v534_v0 }
 0x106   :  { %v3436_v3 = vpop.eup %2620 }
 0x107   :  { %v3438_v4 = vpop.eup %2622  ;;  %v2288_v5 = vpop.f32.mrb[20].mxu0  ;;  %v2439_v8 = vpack.c.bf16 %v3436_v3, %v3431_v1 }
 0x108   :  { %v555_v9 = vadd.f32 %v2288_v5, %v3310_v41  ;;  %v546_v11 = vpop.f32.mrb[21].mxu0  ;;  %v2433_v12 = vpack.c.bf16 %v3438_v4, %v3434_v2 }
 0x109   :  { %v547_v14 = vadd.f32 %v3310_v41, %v546_v11  ;;  %v2289_v16 = vpop.f32.mrb[22].mxu0 }
 0x10a   :  { %2632 = vtanh.f32 %v555_v9  ;;  %v558_v17 = vadd.f32 %v2289_v16, %v3310_v41  ;;  %v549_v18 = vpop.f32.mrb[23].mxu0 }
 0x10b   :  { %2634 = vtanh.f32 %v547_v14  ;;  %v550_v20 = vadd.f32 %v3310_v41, %v549_v18 }
 0x10c   :  { %v2625_v21 = vpop.eup %2624  ;;  %2636 = vtanh.f32 %v558_v17 }
 0x10d   :  { %v2627_v22 = vpop.eup %2626  ;;  %2638 = vtanh.f32 %v550_v20 }
 0x10e   :  { %v2629_v23 = vpop.eup %2628 }
 0x10f   :  { %v2631_v24 = vpop.eup %2630  ;;  %v2292_v25 = vpop.f32.mrb[24].mxu0  ;;  %v2400_v29 = vpack.c.bf16 %v2629_v23, %v2625_v21  ;;  %v2874_v21 = vmov 0  }
 0x110   :  { %v571_v31 = vadd.f32 %v2292_v25, %v3310_v41  ;;  %v562_v32 = vpop.f32.mrb[25].mxu0  ;;  %v2394_v35 = vpack.c.bf16 %v2631_v24, %v2627_v22  ;;  %2589 = vset.pattern.permute.xlu0 %v2874_v21  ;;  %v1106_v22 = vld [vmem:[#allocation2] sm:$0x1] }
 0x111   :  { %v563_v37 = vadd.f32 %v3310_v41, %v562_v32  ;;  %v2293_v38 = vpop.f32.mrb[26].mxu0  ;;  %1109 = vperm.xlu0 %2589, %v1106_v22  }
 0x112   :  { %2640 = vtanh.f32 %v571_v31  ;;  %v574_v39 = vadd.f32 %v2293_v38, %v3310_v41  ;;  %v565_v42 = vpop.f32.mrb[27].mxu0  ;;  %2396 = vmatprep.subr.msk.bf16.mxu1 %vm3450_vm2, %v2394_v35 }
 0x113   :  { %2642 = vtanh.f32 %v563_v37  ;;  %v566_v43 = vadd.f32 %v3310_v41, %v565_v42  ;;  %2399 = vmatpush3.bf16.xpose.msk.msra.mxu1 %vm3450_vm2, %v2397_v19 }
 0x114   :  { %v2633_v44 = vpop.eup %2632  ;;  %2644 = vtanh.f32 %v574_v39  ;;  %2402 = vmatprep.subr.msk.bf16.mxu1 %vm3450_vm2, %v2400_v29 }
 0x115   :  { %v2635_v45 = vpop.eup %2634  ;;  %2646 = vtanh.f32 %v566_v43 }
 0x116   :  { %v2637_v46 = vpop.eup %2636 }
 0x117   :  { %v2639_v47 = vpop.eup %2638  ;;  %v2296_v50 = vpop.f32.mrb[28].mxu0  ;;  %v2412_v51 = vpack.c.bf16 %v2637_v46, %v2633_v44 }
 0x118   :  { %v587_v54 = vadd.f32 %v2296_v50, %v3310_v41  ;;  %v578_v56 = vpop.f32.mrb[29].mxu0  ;;  %v2406_v57 = vpack.c.bf16 %v2639_v47, %v2635_v45 }
 0x119   :  { %v579_v7 = vadd.f32 %v3310_v41, %v578_v56  ;;  %v2297_v13 = vpop.f32.mrb[30].mxu0 }
 0x11a   :  { %2648 = vtanh.f32 %v587_v54  ;;  %v590_v19 = vadd.f32 %v2297_v13, %v3310_v41  ;;  %v581_v58 = vpop.f32.mrb[31].mxu0 }
 0x11b   :  { %2650 = vtanh.f32 %v579_v7  ;;  %v582_v60 = vadd.f32 %v3310_v41, %v581_v58  ;;  %2405 = vmatpush3.bf16.xpose.msk.msra.mxu1 %vm3450_vm2, %v2403_v15 }
 0x11c   :  { %v3476_v61 = vpop.eup %2640  ;;  %2652 = vtanh.f32 %v590_v19  ;;  %2408 = vmatprep.subr.msk.bf16.mxu1 %vm3450_vm2, %v2406_v57 }
 0x11d   :  { %v2643_v62 = vpop.eup %2642  ;;  %2654 = vtanh.f32 %v582_v60 }
 0x11e   :  { %v2645_v63 = vpop.eup %2644 }
 0x11f   :  { %v2647_v0 = vpop.eup %2646  ;;  %v2300_v5 = vpop.f32.mrb[32].mxu0  ;;  %v2424_v9 = vpack.c.bf16 %v2645_v63, %v3476_v61 }
 0x120   :  { %v603_v11 = vadd.f32 %v2300_v5, %v3310_v41  ;;  %v594_v14 = vpop.f32.mrb[33].mxu0  ;;  %v2418_v6 = vpack.c.bf16 %v2647_v0, %v2643_v62 }
 0x121   :  { %v595_v10 = vadd.f32 %v3310_v41, %v594_v14  ;;  %v2301_v15 = vpop.f32.mrb[34].mxu0 }
 0x122   :  { %2656 = vtanh.f32 %v603_v11  ;;  %v606_v16 = vadd.f32 %v2301_v15, %v3310_v41  ;;  %v597_v17 = vpop.f32.mrb[35].mxu0 }
 0x123   :  { %2658 = vtanh.f32 %v595_v10  ;;  %v598_v18 = vadd.f32 %v3310_v41, %v597_v17  ;;  %2411 = vmatpush3.bf16.xpose.msk.msra.mxu1 %vm3450_vm2, %v2409_v40 }
 0x124   :  { %v3490_v20 = vpop.eup %2648  ;;  %2660 = vtanh.f32 %v606_v16  ;;  %2414 = vmatprep.subr.msk.bf16.mxu1 %vm3450_vm2, %v2412_v51 }
 0x125   :  { %v2651_v23 = vpop.eup %2650  ;;  %2662 = vtanh.f32 %v598_v18 }
 0x126   :  { %v3494_v24 = vpop.eup %2652 }
 0x127   :  { %v2655_v25 = vpop.eup %2654  ;;  %v2304_v29 = vpop.f32.mrb[36].mxu0  ;;  %v2436_v27 = vpack.c.bf16 %v3494_v24, %v3490_v20 }
 0x128   :  { %v619_v34 = vadd.f32 %v2304_v29, %v3310_v41  ;;  %v610_v40 = vpop.f32.mrb[37].mxu0  ;;  %v2430_v31 = vpack.c.bf16 %v2655_v25, %v2651_v23 }
 0x129   :  { %v611_v32 = vadd.f32 %v3310_v41, %v610_v40  ;;  %v2305_v35 = vpop.f32.mrb[38].mxu0 }
 0x12a   :  { %2664 = vtanh.f32 %v619_v34  ;;  %v622_v37 = vadd.f32 %v2305_v35, %v3310_v41  ;;  %v613_v38 = vpop.f32.mrb[39].mxu0 }
 0x12b   :  { %2666 = vtanh.f32 %v611_v32  ;;  %v614_v39 = vadd.f32 %v3310_v41, %v613_v38  ;;  %2417 = vmatpush3.bf16.xpose.msk.msra.mxu1 %vm3450_vm2, %v2415_v36 }
 0x12c   :  { %v3507_v42 = vpop.eup %2656  ;;  %2668 = vtanh.f32 %v622_v37  ;;  %2420 = vmatprep.subr.msk.bf16.mxu1 %vm3450_vm2, %v2418_v6 }
 0x12d   :  { %v3511_v43 = vpop.eup %2658  ;;  %2670 = vtanh.f32 %v614_v39 }
 0x12e   :  { %v3513_v44 = vpop.eup %2660 }
 0x12f   :  { %v3515_v45 = vpop.eup %2662  ;;  %v2308_v46 = vpop.f32.mrb[40].mxu0  ;;  %v2451_v26 = vpack.c.bf16 %v3513_v44, %v3507_v42 }
 0x130   :  { %v635_v30 = vadd.f32 %v2308_v46, %v3310_v41  ;;  %v626_v36 = vpop.f32.mrb[41].mxu0  ;;  %v2445_v47 = vpack.c.bf16 %v3515_v45, %v3511_v43 }
 0x131   :  { %v627_v50 = vadd.f32 %v3310_v41, %v626_v36  ;;  %v2309_v51 = vpop.f32.mrb[42].mxu0 }
 0x132   :  { %2672 = vtanh.f32 %v635_v30  ;;  %v638_v54 = vadd.f32 %v2309_v51, %v3310_v41  ;;  %v629_v56 = vpop.f32.mrb[43].mxu0 }
 0x133   :  { %2674 = vtanh.f32 %v627_v50  ;;  %v630_v57 = vadd.f32 %v3310_v41, %v629_v56  ;;  %2423 = vmatpush3.bf16.xpose.msk.msra.mxu1 %vm3450_vm2, %v2421_v59 }
 0x134   :  { %v3530_v7 = vpop.eup %2664  ;;  %2676 = vtanh.f32 %v638_v54  ;;  %2426 = vmatprep.subr.msk.bf16.mxu1 %vm3450_vm2, %v2424_v9 }
 0x135   :  { %v3534_v13 = vpop.eup %2666  ;;  %2678 = vtanh.f32 %v630_v57 }
 0x136   :  { %v3536_v19 = vpop.eup %2668 }
 0x137   :  { %v3538_v58 = vpop.eup %2670  ;;  %v2312_v60 = vpop.f32.mrb[44].mxu0  ;;  %v2463_v49 = vpack.c.bf16 %v3536_v19, %v3530_v7 }
 0x138   :  { %v651_v53 = vadd.f32 %v2312_v60, %v3310_v41  ;;  %v642_v59 = vpop.f32.mrb[45].mxu0  ;;  %v2457_v61 = vpack.c.bf16 %v3538_v58, %v3534_v13 }
 0x139   :  { %v643_v62 = vadd.f32 %v3310_v41, %v642_v59  ;;  %v2313_v63 = vpop.f32.mrb[46].mxu0 }
 0x13a   :  { %2680 = vtanh.f32 %v651_v53  ;;  %v654_v0 = vadd.f32 %v2313_v63, %v3310_v41  ;;  %v645_v5 = vpop.f32.mrb[47].mxu0 }
 0x13b   :  { %2682 = vtanh.f32 %v643_v62  ;;  %v646_v9 = vadd.f32 %v3310_v41, %v645_v5  ;;  %2429 = vmatpush3.bf16.xpose.msk.msra.mxu1 %vm3450_vm2, %v2427_v55 }
 0x13c   :  { %v3553_v11 = vpop.eup %2672  ;;  %2684 = vtanh.f32 %v654_v0  ;;  %2432 = vmatprep.subr.msk.bf16.mxu1 %vm3450_vm2, %v2430_v31 }
 0x13d   :  { %v3557_v14 = vpop.eup %2674  ;;  %2686 = vtanh.f32 %v646_v9 }
 0x13e   :  { %v3559_v6 = vpop.eup %2676 }
 0x13f   :  { %v3561_v10 = vpop.eup %2678  ;;  %v2316_v15 = vpop.f32.mrb[48].mxu0  ;;  %v2475_v48 = vpack.c.bf16 %v3559_v6, %v3553_v11 }
 0x140   :  { %v667_v52 = vadd.f32 %v2316_v15, %v3310_v41  ;;  %v658_v55 = vpop.f32.mrb[49].mxu0  ;;  %v2469_v16 = vpack.c.bf16 %v3561_v10, %v3557_v14 }
 0x141   :  { %v659_v17 = vadd.f32 %v3310_v41, %v658_v55  ;;  %v2317_v18 = vpop.f32.mrb[50].mxu0 }
 0x142   :  { %2688 = vtanh.f32 %v667_v52  ;;  %v670_v21 = vadd.f32 %v2317_v18, %v3310_v41  ;;  %v661_v22 = vpop.f32.mrb[51].mxu0 }
 0x143   :  { %2690 = vtanh.f32 %v659_v17  ;;  %v662_v23 = vadd.f32 %v3310_v41, %v661_v22  ;;  %2435 = vmatpush3.bf16.xpose.msk.msra.mxu1 %vm3450_vm2, %v2433_v12 }
 0x144   :  { %v3576_v25 = vpop.eup %2680  ;;  %2692 = vtanh.f32 %v670_v21  ;;  %2438 = vmatprep.subr.msk.bf16.mxu1 %vm3450_vm2, %v2436_v27 }
 0x145   :  { %v3583_v29 = vpop.eup %2682  ;;  %2694 = vtanh.f32 %v662_v23 }
 0x146   :  { %v3585_v34 = vpop.eup %2684 }
 0x147   :  { %v3587_v40 = vpop.eup %2686  ;;  %v2320_v2 = vpop.f32.mrb[52].mxu0  ;;  %v2487_v4 = vpack.c.bf16 %v3585_v34, %v3576_v25 }
 0x148   :  { %v683_v12 = vadd.f32 %v2320_v2, %v3310_v41  ;;  %v674_v31 = vpop.f32.mrb[53].mxu0  ;;  %v2481_v20 = vpack.c.bf16 %v3587_v40, %v3583_v29 }
 0x149   :  { %v675_v24 = vadd.f32 %v3310_v41, %v674_v31  ;;  %v2321_v27 = vpop.f32.mrb[54].mxu0 }
 0x14a   :  { %2696 = vtanh.f32 %v683_v12  ;;  %v686_v32 = vadd.f32 %v2321_v27, %v3310_v41  ;;  %v677_v35 = vpop.f32.mrb[55].mxu0 }
 0x14b   :  { %2698 = vtanh.f32 %v675_v24  ;;  %v678_v37 = vadd.f32 %v3310_v41, %v677_v35  ;;  %2441 = vmatpush3.bf16.xpose.msk.msra.mxu1 %vm3450_vm2, %v2439_v8 }
 0x14c   :  { %v2689_v38 = vpop.eup %2688  ;;  %2700 = vtanh.f32 %v686_v32 }
 0x14d   :  { %v2691_v39 = vpop.eup %2690  ;;  %2702 = vtanh.f32 %v678_v37 }
 0x14e   :  { %v2693_v46 = vpop.eup %2692 }
 0x14f   :  { %v2695_v30 = vpop.eup %2694  ;;  %v2324_v36 = vpop.f32.mrb[56].mxu0  ;;  %v2448_v50 = vpack.c.bf16 %v2693_v46, %v2689_v38 }
 0x150   :  { %v699_v51 = vadd.f32 %v2324_v36, %v3310_v41  ;;  %v690_v54 = vpop.f32.mrb[57].mxu0  ;;  %v2442_v56 = vpack.c.bf16 %v2695_v30, %v2691_v39 }
 0x151   :  { %v691_v57 = vadd.f32 %v3310_v41, %v690_v54  ;;  %v2325_v60 = vpop.f32.mrb[58].mxu0 }
 0x152   :  { %2704 = vtanh.f32 %v699_v51  ;;  %v702_v1 = vadd.f32 %v2325_v60, %v3310_v41  ;;  %v693_v3 = vpop.f32.mrb[59].mxu0  ;;  %2159 = vmatmul.mubr.msk.f32.vlgmr.msra.gmra.mrb[0].mxu1 %vm1116_vm1, %v3288_v33  ;;  %2444 = vmatprep.subr.msk.bf16.mxu1 %vm3450_vm2, %v2442_v56 }
 0x153   :  { %2706 = vtanh.f32 %v691_v57  ;;  %v694_v8 = vadd.f32 %v3310_v41, %v693_v3  ;;  %2447 = vmatpush3.bf16.xpose.msk.msra.mxu1 %vm3450_vm2, %v2445_v47  ;;  %2192 = vmatprep.mubr.msk.f32.mxu1 %vm1116_vm1, %v3288_v33 }
 0x154   :  { %v2697_v53 = vpop.eup %2696  ;;  %2708 = vtanh.f32 %v702_v1  ;;  %2450 = vmatprep.subr.msk.bf16.mxu1 %vm3450_vm2, %v2448_v50 }
 0x155   :  { %v2699_v59 = vpop.eup %2698  ;;  %2710 = vtanh.f32 %v694_v8 }
 0x156   :  { %v2701_v62 = vpop.eup %2700 }
 0x157   :  { %v2703_v63 = vpop.eup %2702  ;;  %v2328_v0 = vpop.f32.mrb[60].mxu0  ;;  %v2460_v5 = vpack.c.bf16 %v2701_v62, %v2697_v53 }
 0x158   :  { %v715_v9 = vadd.f32 %v2328_v0, %v3310_v41  ;;  %v706_v43 = vpop.f32.mrb[61].mxu0  ;;  %v2454_v45 = vpack.c.bf16 %v2703_v63, %v2699_v59 }
 0x159   :  { %v707_v47 = vadd.f32 %v3310_v41, %v706_v43  ;;  %v2329_v15 = vpop.f32.mrb[62].mxu0 }
 0x15a   :  { %2712 = vtanh.f32 %v715_v9  ;;  %v718_v52 = vadd.f32 %v2329_v15, %v3310_v41  ;;  %v709_v55 = vpop.f32.mrb[63].mxu0 }
 0x15b   :  { %2714 = vtanh.f32 %v707_v47  ;;  %v710_v17 = vadd.f32 %v3310_v41, %v709_v55  ;;  %2453 = vmatpush3.bf16.xpose.msk.msra.mxu1 %vm3450_vm2, %v2451_v26 }
 0x15c   :  { %v3628_v18 = vpop.eup %2704  ;;  %2716 = vtanh.f32 %v718_v52  ;;  %2456 = vmatprep.subr.msk.bf16.mxu1 %vm3450_vm2, %v2454_v45 }
 0x15d   :  { %v2707_v21 = vpop.eup %2706  ;;  %2718 = vtanh.f32 %v710_v17 }
 0x15e   :  { %v2709_v22 = vpop.eup %2708 }
 0x15f   :  { %v2711_v23 = vpop.eup %2710  ;;  %v2332_v2 = vpop.f32.mrb[64].mxu0  ;;  %v2472_v12 = vpack.c.bf16 %v2709_v22, %v3628_v18 }
 0x160   :  { %v731_v31 = vadd.f32 %v2332_v2, %v3310_v41  ;;  %v722_v24 = vpop.f32.mrb[65].mxu0  ;;  %v2466_v42 = vpack.c.bf16 %v2711_v23, %v2707_v21 }
 0x161   :  { %v723_v44 = vadd.f32 %v3310_v41, %v722_v24  ;;  %v2333_v26 = vpop.f32.mrb[66].mxu0 }
 0x162   :  { %2720 = vtanh.f32 %v731_v31  ;;  %v734_v27 = vadd.f32 %v2333_v26, %v3310_v41  ;;  %v725_v32 = vpop.f32.mrb[67].mxu0 }
 0x163   :  { %2722 = vtanh.f32 %v723_v44  ;;  %v726_v35 = vadd.f32 %v3310_v41, %v725_v32  ;;  %2459 = vmatpush3.bf16.xpose.msk.msra.mxu1 %vm3450_vm2, %v2457_v61 }
 0x164   :  { %v3642_v37 = vpop.eup %2712  ;;  %2724 = vtanh.f32 %v734_v27  ;;  %2462 = vmatprep.subr.msk.bf16.mxu1 %vm3450_vm2, %v2460_v5 }
 0x165   :  { %v2715_v38 = vpop.eup %2714  ;;  %2726 = vtanh.f32 %v726_v35 }
 0x166   :  { %v3646_v39 = vpop.eup %2716 }
 0x167   :  { %v2719_v46 = vpop.eup %2718  ;;  %v2336_v30 = vpop.f32.mrb[68].mxu0  ;;  %v2484_v36 = vpack.c.bf16 %v3646_v39, %v3642_v37 }
 0x168   :  { %v747_v13 = vadd.f32 %v2336_v30, %v3310_v41  ;;  %v738_v58 = vpop.f32.mrb[69].mxu0  ;;  %v2478_v50 = vpack.c.bf16 %v2719_v46, %v2715_v38 }
 0x169   :  { %v739_v61 = vadd.f32 %v3310_v41, %v738_v58  ;;  %v2337_v51 = vpop.f32.mrb[70].mxu0 }
 0x16a   :  { %2728 = vtanh.f32 %v747_v13  ;;  %v750_v54 = vadd.f32 %v2337_v51, %v3310_v41  ;;  %v741_v56 = vpop.f32.mrb[71].mxu0 }
 0x16b   :  { %2730 = vtanh.f32 %v739_v61  ;;  %v742_v57 = vadd.f32 %v3310_v41, %v741_v56  ;;  %2465 = vmatpush3.bf16.xpose.msk.msra.mxu1 %vm3450_vm2, %v2463_v49 }
 0x16c   :  { %v3659_v60 = vpop.eup %2720  ;;  %2732 = vtanh.f32 %v750_v54  ;;  %2468 = vmatprep.subr.msk.bf16.mxu1 %vm3450_vm2, %v2466_v42 }
 0x16d   :  { %v3663_v1 = vpop.eup %2722  ;;  %2734 = vtanh.f32 %v742_v57 }
 0x16e   :  { %v3665_v3 = vpop.eup %2724 }
 0x16f   :  { %v3667_v8 = vpop.eup %2726  ;;  %v2340_v53 = vpop.f32.mrb[72].mxu0  ;;  %v2499_v7 = vpack.c.bf16 %v3665_v3, %v3659_v60  ;;  %v3789_v3 = vld [vmem:[%s3995_s2] ss:$0 sm:$0xff] }
 0x170   :  { %v763_v19 = vadd.f32 %v2340_v53, %v3310_v41  ;;  %v754_v49 = vpop.f32.mrb[73].mxu0  ;;  %v2493_v59 = vpack.c.bf16 %v3667_v8, %v3663_v1 }
 0x171   :  { %v755_v62 = vadd.f32 %v3310_v41, %v754_v49  ;;  %v2341_v63 = vpop.f32.mrb[74].mxu0 }
 0x172   :  { %2736 = vtanh.f32 %v763_v19  ;;  %v766_v0 = vadd.f32 %v2341_v63, %v3310_v41  ;;  %v757_v5 = vpop.f32.mrb[75].mxu0 }
 0x173   :  { %2738 = vtanh.f32 %v755_v62  ;;  %v758_v9 = vadd.f32 %v3310_v41, %v757_v5  ;;  %2471 = vmatpush3.bf16.xpose.msk.msra.mxu1 %vm3450_vm2, %v2469_v16 }
 0x174   :  { %v3682_v43 = vpop.eup %2728  ;;  %2740 = vtanh.f32 %v766_v0  ;;  %2474 = vmatprep.subr.msk.bf16.mxu1 %vm3450_vm2, %v2472_v12 }
 0x175   :  { %v3686_v45 = vpop.eup %2730  ;;  %2742 = vtanh.f32 %v758_v9 }
 0x176   :  { %v3688_v47 = vpop.eup %2732 }
 0x177   :  { %v3690_v15 = vpop.eup %2734  ;;  %v2344_v52 = vpop.f32.mrb[76].mxu0  ;;  %v2511_v14 = vpack.c.bf16 %v3688_v47, %v3682_v43 }
 0x178   :  { %v779_v10 = vadd.f32 %v2344_v52, %v3310_v41  ;;  %v770_v16 = vpop.f32.mrb[77].mxu0  ;;  %v2505_v55 = vpack.c.bf16 %v3690_v15, %v3686_v45 }
 0x179   :  { %v771_v17 = vadd.f32 %v3310_v41, %v770_v16  ;;  %v2345_v18 = vpop.f32.mrb[78].mxu0 }
 0x17a   :  { %2744 = vtanh.f32 %v779_v10  ;;  %v782_v21 = vadd.f32 %v2345_v18, %v3310_v41  ;;  %v773_v22 = vpop.f32.mrb[79].mxu0 }
 0x17b   :  { %2746 = vtanh.f32 %v771_v17  ;;  %v774_v23 = vadd.f32 %v3310_v41, %v773_v22  ;;  %2477 = vmatpush3.bf16.xpose.msk.msra.mxu1 %vm3450_vm2, %v2475_v48 }
 0x17c   :  { %v3705_v2 = vpop.eup %2736  ;;  %2748 = vtanh.f32 %v782_v21  ;;  %2480 = vmatprep.subr.msk.bf16.mxu1 %vm3450_vm2, %v2478_v50 }
 0x17d   :  { %v3709_v12 = vpop.eup %2738  ;;  %2750 = vtanh.f32 %v774_v23 }
 0x17e   :  { %v3711_v31 = vpop.eup %2740 }
 0x17f   :  { %v3713_v24 = vpop.eup %2742  ;;  %v2348_v42 = vpop.f32.mrb[80].mxu0  ;;  %v2523_v11 = vpack.c.bf16 %v3711_v31, %v3705_v2 }
 0x180   :  { %v795_v6 = vadd.f32 %v2348_v42, %v3310_v41  ;;  %v786_v48 = vpop.f32.mrb[81].mxu0  ;;  %v2517_v44 = vpack.c.bf16 %v3713_v24, %v3709_v12 }
 0x181   :  { %v787_v26 = vadd.f32 %v3310_v41, %v786_v48  ;;  %v2349_v27 = vpop.f32.mrb[82].mxu0 }
 0x182   :  { %2752 = vtanh.f32 %v795_v6  ;;  %v798_v32 = vadd.f32 %v2349_v27, %v3310_v41  ;;  %v789_v35 = vpop.f32.mrb[83].mxu0 }
 0x183   :  { %2754 = vtanh.f32 %v787_v26  ;;  %v790_v38 = vadd.f32 %v3310_v41, %v789_v35  ;;  %2483 = vmatpush3.bf16.xpose.msk.msra.mxu1 %vm3450_vm2, %v2481_v20 }
 0x184   :  { %v3728_v46 = vpop.eup %2744  ;;  %2756 = vtanh.f32 %v798_v32  ;;  %2486 = vmatprep.subr.msk.bf16.mxu1 %vm3450_vm2, %v2484_v36 }
 0x185   :  { %v3735_v30 = vpop.eup %2746  ;;  %2758 = vtanh.f32 %v790_v38 }
 0x186   :  { %v3737_v13 = vpop.eup %2748 }
 0x187   :  { %v3739_v58 = vpop.eup %2750  ;;  %v2352_v29 = vpop.f32.mrb[84].mxu0  ;;  %v2535_v40 = vpack.c.bf16 %v3737_v13, %v3728_v46 }
 0x188   :  { %v811_v20 = vadd.f32 %v2352_v29, %v3310_v41  ;;  %v802_v50 = vpop.f32.mrb[85].mxu0  ;;  %v2529_v37 = vpack.c.bf16 %v3739_v58, %v3735_v30 }
 0x189   :  { %v803_v39 = vadd.f32 %v3310_v41, %v802_v50  ;;  %v2353_v36 = vpop.f32.mrb[86].mxu0 }
 0x18a   :  { %2760 = vtanh.f32 %v811_v20  ;;  %v814_v61 = vadd.f32 %v2353_v36, %v3310_v41  ;;  %v805_v51 = vpop.f32.mrb[87].mxu0 }
 0x18b   :  { %2762 = vtanh.f32 %v803_v39  ;;  %v806_v54 = vadd.f32 %v3310_v41, %v805_v51  ;;  %2489 = vmatpush3.bf16.xpose.msk.msra.mxu1 %vm3450_vm2, %v2487_v4 }
 0x18c   :  { %v2753_v56 = vpop.eup %2752  ;;  %2764 = vtanh.f32 %v814_v61 }
 0x18d   :  { %v2755_v57 = vpop.eup %2754  ;;  %2766 = vtanh.f32 %v806_v54 }
 0x18e   :  { %v2757_v53 = vpop.eup %2756 }
 0x18f   :  { %v2759_v19 = vpop.eup %2758  ;;  %v2356_v49 = vpop.f32.mrb[88].mxu0  ;;  %v2496_v62 = vpack.c.bf16 %v2757_v53, %v2753_v56 }
 0x190   :  { %v827_v63 = vadd.f32 %v2356_v49, %v3310_v41  ;;  %v818_v0 = vpop.f32.mrb[89].mxu0  ;;  %v2490_v5 = vpack.c.bf16 %v2759_v19, %v2755_v57 }
 0x191   :  { %v819_v9 = vadd.f32 %v3310_v41, %v818_v0  ;;  %v2357_v52 = vpop.f32.mrb[90].mxu0 }
 0x192   :  { %2768 = vtanh.f32 %v827_v63  ;;  %v830_v25 = vadd.f32 %v2357_v52, %v3310_v41  ;;  %v821_v34 = vpop.f32.mrb[91].mxu0  ;;  %2193 = vmatmul.mubr.msk.f32.vlgmr.msra.gmra.mrb[2].mxu1 %vm1116_vm1, %v3288_v33  ;;  %2492 = vmatprep.subr.msk.bf16.mxu1 %vm3450_vm2, %v2490_v5 }
 0x193   :  { %2770 = vtanh.f32 %v819_v9  ;;  %v822_v4 = vadd.f32 %v3310_v41, %v821_v34  ;;  %2495 = vmatpush3.bf16.xpose.msk.msra.mxu1 %vm3450_vm2, %v2493_v59  ;;  %2226 = vmatprep.mubr.msk.f32.mxu1 %vm1116_vm1, %v3288_v33 }
 0x194   :  { %v2761_v10 = vpop.eup %2760  ;;  %2772 = vtanh.f32 %v830_v25  ;;  %2498 = vmatprep.subr.msk.bf16.mxu1 %vm3450_vm2, %v2496_v62 }
 0x195   :  { %v2763_v16 = vpop.eup %2762  ;;  %2774 = vtanh.f32 %v822_v4 }
 0x196   :  { %v2765_v17 = vpop.eup %2764 }
 0x197   :  { %v2767_v18 = vpop.eup %2766  ;;  %v2360_v21 = vpop.f32.mrb[92].mxu0  ;;  %v2508_v22 = vpack.c.bf16 %v2765_v17, %v2761_v10 }
 0x198   :  { %v843_v23 = vadd.f32 %v2360_v21, %v3310_v41  ;;  %v834_v1 = vpop.f32.mrb[93].mxu0  ;;  %v2502_v8 = vpack.c.bf16 %v2767_v18, %v2763_v16 }
 0x199   :  { %v835_v59 = vadd.f32 %v3310_v41, %v834_v1  ;;  %v2361_v42 = vpop.f32.mrb[94].mxu0 }
 0x19a   :  { %2776 = vtanh.f32 %v843_v23  ;;  %v846_v33 = vadd.f32 %v2361_v42, %v3310_v41  ;;  %v837_v6 = vpop.f32.mrb[95].mxu0 }
 0x19b   :  { %2778 = vtanh.f32 %v835_v59  ;;  %v838_v48 = vadd.f32 %v3310_v41, %v837_v6  ;;  %2501 = vmatpush3.bf16.xpose.msk.msra.mxu1 %vm3450_vm2, %v2499_v7 }
 0x19c   :  { %v3780_v26 = vpop.eup %2768  ;;  %2780 = vtanh.f32 %v846_v33  ;;  %2504 = vmatprep.subr.msk.bf16.mxu1 %vm3450_vm2, %v2502_v8 }
 0x19d   :  { %v2771_v27 = vpop.eup %2770  ;;  %2782 = vtanh.f32 %v838_v48 }
 0x19e   :  { %v2773_v32 = vpop.eup %2772 }
 0x19f   :  { %v2775_v35 = vpop.eup %2774  ;;  %v2364_v38 = vpop.f32.mrb[96].mxu0  ;;  %v2520_v29 = vpack.c.bf16 %v2773_v32, %v3780_v26 }
 0x1a0   :  { %v859_v20 = vadd.f32 %v2364_v38, %v3310_v41  ;;  %v850_v50 = vpop.f32.mrb[97].mxu0  ;;  %v2514_v60 = vpack.c.bf16 %v2775_v35, %v2771_v27 }
 0x1a1   :  { %v851_v7 = vadd.f32 %v3789_v3, %v850_v50  ;;  %v2365_v39 = vpop.f32.mrb[98].mxu0 }
 0x1a2   :  { %2784 = vtanh.f32 %v859_v20  ;;  %v862_v36 = vadd.f32 %v3789_v3, %v2365_v39  ;;  %v853_v61 = vpop.f32.mrb[99].mxu0 }
 0x1a3   :  { %2786 = vtanh.f32 %v851_v7  ;;  %v854_v51 = vadd.f32 %v3789_v3, %v853_v61  ;;  %2507 = vmatpush3.bf16.xpose.msk.msra.mxu1 %vm3450_vm2, %v2505_v55 }
 0x1a4   :  { %v3799_v41 = vpop.eup %2776  ;;  %2788 = vtanh.f32 %v862_v36  ;;  %2510 = vmatprep.subr.msk.bf16.mxu1 %vm3450_vm2, %v2508_v22 }
 0x1a5   :  { %v2779_v54 = vpop.eup %2778  ;;  %2790 = vtanh.f32 %v854_v51 }
 0x1a6   :  { %v3803_v56 = vpop.eup %2780 }
 0x1a7   :  { %v2783_v57 = vpop.eup %2782  ;;  %v2368_v53 = vpop.f32.mrb[100].mxu0  ;;  %v2532_v19 = vpack.c.bf16 %v3803_v56, %v3799_v41 }
 0x1a8   :  { %v875_v45 = vadd.f32 %v3789_v3, %v2368_v53  ;;  %v866_v15 = vpop.f32.mrb[101].mxu0  ;;  %v2526_v49 = vpack.c.bf16 %v2783_v57, %v2779_v54 }
 0x1a9   :  { %v867_v55 = vadd.f32 %v3789_v3, %v866_v15  ;;  %v2369_v62 = vpop.f32.mrb[102].mxu0 }
 0x1aa   :  { %2792 = vtanh.f32 %v875_v45  ;;  %v878_v63 = vadd.f32 %v3789_v3, %v2369_v62  ;;  %v869_v0 = vpop.f32.mrb[103].mxu0 }
 0x1ab   :  { %2794 = vtanh.f32 %v867_v55  ;;  %v870_v5 = vadd.f32 %v3789_v3, %v869_v0  ;;  %2513 = vmatpush3.bf16.xpose.msk.msra.mxu1 %vm3450_vm2, %v2511_v14 }
 0x1ac   :  { %v3816_v9 = vpop.eup %2784  ;;  %2796 = vtanh.f32 %v878_v63  ;;  %2516 = vmatprep.subr.msk.bf16.mxu1 %vm3450_vm2, %v2514_v60 }
 0x1ad   :  { %v3820_v52 = vpop.eup %2786  ;;  %2798 = vtanh.f32 %v870_v5 }
 0x1ae   :  { %v3822_v25 = vpop.eup %2788 }
 0x1af   :  { %v3824_v34 = vpop.eup %2790  ;;  %v2372_v4 = vpop.f32.mrb[104].mxu0  ;;  %v2547_v43 = vpack.c.bf16 %v3822_v25, %v3816_v9 }
 0x1b0   :  { %v891_v47 = vadd.f32 %v3789_v3, %v2372_v4  ;;  %v882_v14 = vpop.f32.mrb[105].mxu0  ;;  %v2541_v10 = vpack.c.bf16 %v3824_v34, %v3820_v52 }
 0x1b1   :  { %v883_v16 = vadd.f32 %v3789_v3, %v882_v14  ;;  %v2373_v17 = vpop.f32.mrb[106].mxu0 }
 0x1b2   :  { %2800 = vtanh.f32 %v891_v47  ;;  %v894_v18 = vadd.f32 %v3789_v3, %v2373_v17  ;;  %v885_v21 = vpop.f32.mrb[107].mxu0 }
 0x1b3   :  { %2802 = vtanh.f32 %v883_v16  ;;  %v886_v22 = vadd.f32 %v3789_v3, %v885_v21  ;;  %2519 = vmatpush3.bf16.xpose.msk.msra.mxu1 %vm3450_vm2, %v2517_v44 }
 0x1b4   :  { %v3839_v23 = vpop.eup %2792  ;;  %2804 = vtanh.f32 %v894_v18  ;;  %2522 = vmatprep.subr.msk.bf16.mxu1 %vm3450_vm2, %v2520_v29 }
 0x1b5   :  { %v3843_v1 = vpop.eup %2794  ;;  %2806 = vtanh.f32 %v886_v22 }
 0x1b6   :  { %v3845_v8 = vpop.eup %2796 }
 0x1b7   :  { %v3847_v59 = vpop.eup %2798  ;;  %v2376_v42 = vpop.f32.mrb[108].mxu0  ;;  %v2559_v12 = vpack.c.bf16 %v3845_v8, %v3839_v23  ;;  %v1112_v23 = vlaneseq }
 0x1b8   :  { %v907_v24 = vadd.f32 %v3789_v3, %v2376_v42  ;;  %v898_v44 = vpop.f32.mrb[109].mxu0  ;;  %v2553_v33 = vpack.c.bf16 %v3847_v59, %v3843_v1  ;;  %v1110_v59 = vpop.permute.xlu0 %1109 }
 0x1b9   :  { %v899_v6 = vadd.f32 %v3789_v3, %v898_v44  ;;  %v2377_v48 = vpop.f32.mrb[110].mxu0  ;;  %v1113_v1 = vshrl.u32 %v1112_v23, 7 }
 0x1ba   :  { %2808 = vtanh.f32 %v907_v24  ;;  %v910_v26 = vadd.f32 %v3789_v3, %v2377_v48  ;;  %v901_v27 = vpop.f32.mrb[111].mxu0 }
 0x1bb   :  { %2810 = vtanh.f32 %v899_v6  ;;  %v902_v32 = vadd.f32 %v3789_v3, %v901_v27  ;;  %2525 = vmatpush3.bf16.xpose.msk.msra.mxu1 %vm3450_vm2, %v2523_v11  ;;  %v1114_v8 = vsub.s32 0, %v1113_v1 }
 0x1bc   :  { %v3862_v35 = vpop.eup %2800  ;;  %2812 = vtanh.f32 %v910_v26  ;;  %2528 = vmatprep.subr.msk.bf16.mxu1 %vm3450_vm2, %v2526_v49 }
 0x1bd   :  { %v3866_v38 = vpop.eup %2802  ;;  %2814 = vtanh.f32 %v902_v32 }
 0x1be   :  { %v3868_v29 = vpop.eup %2804 }
 0x1bf   :  { %v3870_v20 = vpop.eup %2806  ;;  %v2380_v50 = vpop.f32.mrb[112].mxu0  ;;  %v2571_v2 = vpack.c.bf16 %v3868_v29, %v3862_v35 }
 0x1c0   :  { %v923_v31 = vadd.f32 %v3789_v3, %v2380_v50  ;;  %v914_v11 = vpop.f32.mrb[113].mxu0  ;;  %v2565_v60 = vpack.c.bf16 %v3870_v20, %v3866_v38 }
 0x1c1   :  { %v915_v7 = vadd.f32 %v3789_v3, %v914_v11  ;;  %v2381_v39 = vpop.f32.mrb[114].mxu0 }
 0x1c2   :  { %2816 = vtanh.f32 %v923_v31  ;;  %v926_v36 = vadd.f32 %v3789_v3, %v2381_v39  ;;  %v917_v61 = vpop.f32.mrb[115].mxu0 }
 0x1c3   :  { %2818 = vtanh.f32 %v915_v7  ;;  %v918_v51 = vadd.f32 %v3789_v3, %v917_v61  ;;  %2531 = vmatpush3.bf16.xpose.msk.msra.mxu1 %vm3450_vm2, %v2529_v37 }
 0x1c4   :  { %v3885_v54 = vpop.eup %2808  ;;  %2820 = vtanh.f32 %v926_v36  ;;  %2534 = vmatprep.subr.msk.bf16.mxu1 %vm3450_vm2, %v2532_v19 }
 0x1c5   :  { %v3892_v57 = vpop.eup %2810  ;;  %2822 = vtanh.f32 %v918_v51 }
 0x1c6   :  { %v3894_v53 = vpop.eup %2812 }
 0x1c7   :  { %v3896_v45 = vpop.eup %2814  ;;  %v2384_v30 = vpop.f32.mrb[116].mxu0  ;;  %v2583_v58 = vpack.c.bf16 %v3894_v53, %v3885_v54 }
 0x1c8   :  { %v939_v37 = vadd.f32 %v3789_v3, %v2384_v30  ;;  %v930_v15 = vpop.f32.mrb[117].mxu0  ;;  %v2577_v41 = vpack.c.bf16 %v3896_v45, %v3892_v57 }
 0x1c9   :  { %v931_v56 = vadd.f32 %v3789_v3, %v930_v15  ;;  %v2385_v19 = vpop.f32.mrb[118].mxu0 }
 0x1ca   :  { %2824 = vtanh.f32 %v939_v37  ;;  %v942_v49 = vadd.f32 %v3789_v3, %v2385_v19  ;;  %v933_v55 = vpop.f32.mrb[119].mxu0 }
 0x1cb   :  { %2537 = vmatpush3.bf16.xpose.msk.msra.mxu1 %vm3450_vm2, %v2535_v40  ;;  %2826 = vtanh.f32 %v931_v56  ;;  %v934_v62 = vadd.f32 %v3789_v3, %v933_v55  ;;  %v2849_v40 = vld [vmem:[%s3996_s3] sm:$0x1]  ;;  %s2876_s3 = smov [#allocation3]  }
 0x1cc   :  { %v2817_v63 = vpop.eup %2816  ;;  %2828 = vtanh.f32 %v942_v49  ;;  %s1853_s16 = sshll.u32 %s2876_s3, 4  ;;  %s1854_s16 = int_to_ptr.vmem [resolvable:$true] %s1853_s16 }
 0x1cd   :  { %v2819_v0 = vpop.eup %2818  ;;  %2830 = vtanh.f32 %v934_v62  ;;  %s2850_s17 = scalar_lea.vmem %s1854_s16, 128  ;;  %p2855_p1 = scmp.lt.s32.totalorder %s1854_s16, %s1854_s16 }
 0x1ce   :  { %v2821_v5 = vpop.eup %2820  ;;  %p2851_p0 = scmp.ne.s32.totalorder %s1854_s16, %s2850_s17  ;;  %p2856_p2 = scmp.lt.s32.totalorder %s2850_s17, %s2850_s17 }
 0x1cf   :  { %v2823_v4 = vpop.eup %2822  ;;  %v2544_v47 = vpack.c.bf16 %v2821_v5, %v2817_v63  ;;  %v2388_v14 = vpop.f32.mrb[120].mxu0 }
 0x1d0   :  { %v2538_v16 = vpack.c.bf16 %v2823_v4, %v2819_v0  ;;  %v955_v17 = vadd.f32 %v3789_v3, %v2388_v14  ;;  %v946_v18 = vpop.f32.mrb[121].mxu0  ;;  %p2857_p3 = por %p2856_p2, %p2855_p1 }
 0x1d1   :  { %v947_v46 = vadd.f32 %v3789_v3, %v946_v18  ;;  %v2389_v13 = vpop.f32.mrb[122].mxu0 }
 0x1d2   :  { %2227 = vmatmul.mubr.msk.f32.vlgmr.msra.gmra.mrb[4].mxu1 %vm1116_vm1, %v2849_v40  ;;  %2540 = vmatprep.subr.msk.bf16.mxu1 %vm3450_vm2, %v2538_v16  ;;  %2832 = vtanh.f32 %v955_v17  ;;  %v958_v21 = vadd.f32 %v3789_v3, %v2389_v13  ;;  %v949_v22 = vpop.f32.mrb[123].mxu0  ;;  %p2858_p4 = pnand %p2857_p3, %p2851_p0 }
 0x1d3   :  { %2543 = vmatpush3.bf16.xpose.msk.msra.mxu1 %vm3450_vm2, %v2541_v10  ;;  %2834 = vtanh.f32 %v947_v46  ;;  %v950_v42 = vadd.f32 %v3789_v3, %v949_v22  ;;  %2260 = vmatprep.mubr.msk.f32.mxu1 %vm1116_vm1, %v2849_v40 }
 0x1d4   :  { %v2825_v24 = vpop.eup %2824  ;;  %2546 = vmatprep.subr.msk.bf16.mxu1 %vm3450_vm2, %v2544_v47  ;;  %2836 = vtanh.f32 %v958_v21 }
 0x1d5   :  { %v2827_v44 = vpop.eup %2826  ;;  %2838 = vtanh.f32 %v950_v42 }
 0x1d6   :  { %v2829_v6 = vpop.eup %2828 }
 0x1d7   :  { %v2831_v48 = vpop.eup %2830  ;;  %v2556_v26 = vpack.c.bf16 %v2829_v6, %v2825_v24  ;;  %v2392_v27 = vpop.f32.mrb[124].mxu0 }
 0x1d8   :  { %v2550_v52 = vpack.c.bf16 %v2831_v48, %v2827_v44  ;;  %v971_v34 = vadd.f32 %v3789_v3, %v2392_v27  ;;  %v962_v10 = vpop.f32.mrb[125].mxu0 }
 0x1d9   :  { %v963_v32 = vadd.f32 %v3789_v3, %v962_v10  ;;  %v2393_v50 = vpop.f32.mrb[126].mxu0 }
 0x1da   :  { %2840 = vtanh.f32 %v971_v34  ;;  %v974_v31 = vadd.f32 %v3789_v3, %v2393_v50  ;;  %v965_v11 = vpop.f32.mrb[127].mxu0 }
 0x1db   :  { %2549 = vmatpush3.bf16.xpose.msk.msra.mxu1 %vm3450_vm2, %v2547_v43  ;;  %2842 = vtanh.f32 %v963_v32  ;;  %v966_v7 = vadd.f32 %v3789_v3, %v965_v11 }
 0x1dc   :  { %v2833_v39 = vpop.eup %2832  ;;  %2552 = vmatprep.subr.msk.bf16.mxu1 %vm3450_vm2, %v2550_v52  ;;  %2844 = vtanh.f32 %v974_v31 }
 0x1dd   :  { %v2835_v36 = vpop.eup %2834  ;;  %2846 = vtanh.f32 %v966_v7 }
 0x1de   :  { %v2837_v61 = vpop.eup %2836 }
 0x1df   :  { %v2839_v51 = vpop.eup %2838  ;;  %v2568_v30 = vpack.c.bf16 %v2837_v61, %v2833_v39 }
 0x1e0   :  { %v2562_v37 = vpack.c.bf16 %v2839_v51, %v2835_v36 }
 0x1e3   :  { %2555 = vmatpush3.bf16.xpose.msk.msra.mxu1 %vm3450_vm2, %v2553_v33 }
 0x1e4   :  { %v2841_v9 = vpop.eup %2840  ;;  %2558 = vmatprep.subr.msk.bf16.mxu1 %vm3450_vm2, %v2556_v26 }
 0x1e5   :  { %v2843_v3 = vpop.eup %2842 }
 0x1e6   :  { %v2845_v25 = vpop.eup %2844 }
 0x1e7   :  { %v2847_v43 = vpop.eup %2846  ;;  %v2580_v15 = vpack.c.bf16 %v2845_v25, %v2841_v9 }
 0x1e8   :  { %v2574_v56 = vpack.c.bf16 %v2847_v43, %v2843_v3 }
 0x1eb   :  { %2561 = vmatpush3.bf16.xpose.msk.msra.mxu1 %vm3450_vm2, %v2559_v12  ;;  %v1115_v12 = vrot.slane %v1110_v59, %v1114_v8 }
 0x1ec   :  { %2564 = vmatprep.subr.msk.bf16.mxu1 %vm3450_vm2, %v2562_v37 }
 0x1f3   :  { %2567 = vmatpush3.bf16.xpose.msk.msra.mxu1 %vm3450_vm2, %v2565_v60 }
 0x1f4   :  { %2570 = vmatprep.subr.msk.bf16.mxu1 %vm3450_vm2, %v2568_v30 }
 0x1fb   :  { %2573 = vmatpush3.bf16.xpose.msk.msra.mxu1 %vm3450_vm2, %v2571_v2  ;;  %v2875_v2 = vmov 1966171168  }
 0x1fc   :  { %2576 = vmatprep.subr.msk.bf16.mxu1 %vm3450_vm2, %v2574_v56  ;;  %v1801_v60 = vunpack.c.l.s4 %v2875_v2 }
 0x1fe   :  { %v1802_v57 = vunpack.c.0.s8 %v1801_v60 }
 0x200   :  { %v1805_v28 = vsub.s32 %v1802_v57, %v1113_v1 }
 0x203   :  { %2579 = vmatpush3.bf16.xpose.msk.msra.mxu1 %vm3450_vm2, %v2577_v41 }
 0x204   :  { %2582 = vmatprep.subr.msk.bf16.mxu1 %vm3450_vm2, %v2580_v15 }
 0x20b   :  { %2585 = vmatpush3.bf16.xpose.msk.msra.mxu1 %vm3450_vm2, %v2583_v58 }
 0x212   :  { %2261 = vmatmul.mubr.msk.f32.vlgmr.msra.gmra.mrb[6].mxu1 %vm1116_vm1, %v2849_v40 }
 0x225   :  { %v1570_v33 = vpop.f32.mrb[0].mxu1 }
 0x226   :  { %v1571_v35 = vadd.f32 %v1570_v33, %v1115_v12  ;;  %v1572_v38 = vpop.f32.mrb[1].mxu1 }
 0x227   :  { %v1573_v29 = vadd.f32 %v1572_v38, %v1115_v12 }
 0x229   :  { %v1796_v20 = vcombine.low %v1571_v35, %v1573_v29 }
 0x22b   :  { %v1806_v19 = vrot.slane %v1796_v20, %v1805_v28 }
 0x265   :  { %v1641_v45 = vpop.f32.mrb[2].mxu1 }
 0x266   :  { %v1642_v54 = vadd.f32 %v1641_v45, %v1115_v12  ;;  %v1643_v53 = vpop.f32.mrb[3].mxu1 }
 0x267   :  { %v1644_v58 = vadd.f32 %v1643_v53, %v1115_v12 }
 0x269   :  { %v1797_v41 = vcombine.low %v1642_v54, %v1644_v58 }
 0x26b   :  { %v1813_v49 = vrot.slane %v1797_v41, %v1805_v28 }
 0x26d   :  { %v1828_v55 = vcombine.low %v1806_v19, %v1813_v49 }
 0x26f   :  { %v1836_v21 = vrot.slane %v1828_v55, %v1805_v28 }
 0x2a5   :  { %v1712_v62 = vpop.f32.mrb[4].mxu1 }
 0x2a6   :  { %v1713_v63 = vadd.f32 %v1712_v62, %v1115_v12  ;;  %v1714_v0 = vpop.f32.mrb[5].mxu1 }
 0x2a7   :  { %v1715_v5 = vadd.f32 %v1714_v0, %v1115_v12 }
 0x2a9   :  { %v1798_v4 = vcombine.low %v1713_v63, %v1715_v5 }
 0x2ab   :  { %v1820_v46 = vrot.slane %v1798_v4, %v1805_v28 }
 0x2e5   :  { %v1783_v47 = vpop.f32.mrb[6].mxu1 }
 0x2e6   :  { %v1784_v14 = vadd.f32 %v1783_v47, %v1115_v12  ;;  %v1785_v16 = vpop.f32.mrb[7].mxu1 }
 0x2e7   :  { %v1786_v17 = vadd.f32 %v1785_v16, %v1115_v12 }
 0x2e9   :  { %v1799_v18 = vcombine.low %v1784_v14, %v1786_v17 }
 0x2eb   :  { %v1827_v13 = vrot.slane %v1799_v18, %v1805_v28 }
 0x2ed   :  { %v1829_v40 = vcombine.low %v1820_v46, %v1827_v13 }
 0x2ef   :  { %v1843_v22 = vrot.slane %v1829_v40, %v1805_v28 }
 0x2f1   :  { %v1844_v42 = vcombine.low %v1836_v21, %v1843_v22 }
 0x2f3   :  { %1846 = vst [vmem:[#allocation3] sm:$0xff] %v1844_v42 }
 0x2f4   :  { %2861 = shalt.err (!%p2858_p4)
}
 0x2f5   :  { %s2862_s20 = scalar_lea.hbm %s3998_s5, 128 }
 0x2f6   :  { %p2863_p5 = scmp.ne.s32.totalorder %s3998_s5, %s2862_s20  ;;  %p2866_p6 = scmp.lt.u32.totalorder %s2862_s20, %s3998_s5 }
 0x2f8   :  { %p2868_p7 = pnand %p2866_p6, %p2863_p5 }
 0x2fa   :  { %2871 = shalt.err (!%p2868_p7)
}
 0x2fb   :  { %1856 = dma.vmem_to_hbm [thread:$0]  %s1854_s16, 128, %s3998_s5, [#allocation4]  }
 0x2fc   :  { %2872 = dma.done.wait [#allocation4], 128  }
 0x2fd   :  { %2873 = vsyncadd [#allocation4], 4294967168 }
 0x2fe   :  { %1860 = vsyncpa [#allocation4], 1 }

</bundles_post_ra>
